<compile_context>
chip_gen: v7x
topology: tpu7x:2x2x1
jax: 0.10.0
libtpu: 0.0.40
codegen_flags: <defaults>
</compile_context>

<pallas_src>
import jax
import jax.numpy as jnp
from jax.experimental import pallas as pl
from jax.experimental.pallas import tpu as pltpu

EPS = 1e-5
GROUPS = 8


def _silu(x):
    return x * jax.nn.sigmoid(x)


def resblock_kernel(x_ref, emb_ref, w1_ref, w2_ref, wr_ref, pc_ref,
                    c2g_ref, g2c_ref, out_ref):
    Bt, L, Cin = x_ref.shape
    Cout = out_ref.shape[-1]
    M = Bt * L
    cg = Cout // GROUPS
    cdt = w1_ref.dtype                      # MXU compute dtype (bf16 or f32)

    # packed per-channel params: rows = [b1, g1, be1, b2, g2, be2, br, pad]
    P = pc_ref[...]
    b1, g1, be1 = P[0:1], P[1:2], P[2:3]
    b2, g2, be2 = P[3:4], P[4:5], P[5:6]
    br = P[6:7]

    # channel<->group one-hot maps (precomputed in the wrapper, fetched once)
    c2g = c2g_ref[...]                      # [Cout, G]
    g2c = g2c_ref[...]                      # [G, Cout]

    # per-sample boundary masks on the fused (Bt*L) row axis
    pos = jax.lax.broadcasted_iota(jnp.int32, (M, 1), 0) % L
    first_row = pos == 0
    last_row = pos == (L - 1)

    def conv_k3(h, w_ref, bias):
        # 'same' (pad=1) conv as three accumulating K=C matmuls.  The +-1 shifts
        # are applied to the f32 accumulators (roll along sublanes, XLU slot),
        # so the bf16 operand is never copied/shifted and no [M,3C] buffer exists.
        hc = h.astype(cdt)
        acc = jnp.dot(hc, w_ref[1], preferred_element_type=jnp.float32)  # tap l
        a0 = jnp.dot(hc, w_ref[0], preferred_element_type=jnp.float32)   # tap l-1
        acc += jnp.where(first_row, 0.0, pltpu.roll(a0, 1, 0))
        a2 = jnp.dot(hc, w_ref[2], preferred_element_type=jnp.float32)   # tap l+1
        acc += jnp.where(last_row, 0.0, pltpu.roll(a2, M - 1, 0))
        return acc + bias

    def group_norm(h2, gamma, beta):
        # GroupNorm(8, C) with per-sample statistics, all stats kept in f32.
        h3 = h2.reshape(Bt, L, Cout)
        n = jnp.float32(L * cg)
        s1 = jnp.sum(h3, axis=1)                                  # [Bt, C]
        s2 = jnp.sum(h3 * h3, axis=1)                             # [Bt, C]
        mean_g = jnp.dot(s1, c2g, preferred_element_type=jnp.float32) / n
        msq_g = jnp.dot(s2, c2g, preferred_element_type=jnp.float32) / n
        var_g = jnp.maximum(msq_g - mean_g * mean_g, 0.0)         # clamp >= 0
        mean_c = jnp.dot(mean_g, g2c, preferred_element_type=jnp.float32)
        inv_c = jax.lax.rsqrt(
            jnp.dot(var_g, g2c, preferred_element_type=jnp.float32) + EPS)
        hn = (h3 - mean_c[:, None, :]) * inv_c[:, None, :]
        return hn.reshape(M, Cout) * gamma + beta

    # conv1 -> norm1
    h = group_norm(conv_k3(x_ref[...].reshape(M, Cin), w1_ref, b1), g1, be1)

    # + (time_mlp + text_mlp): precomputed outside, broadcast over the sequence
    h = (h.reshape(Bt, L, Cout) + emb_ref[...]).reshape(M, Cout)
    h = _silu(h)
    # TODO(synk): nn.Dropout(0.1) is treated as identity (eval-mode semantics).

    # conv2 -> norm2
    h = group_norm(conv_k3(h, w2_ref, b2), g2, be2)

    # residual_conv (1x1 conv == matmul) computed LAST: x_ref is resident in
    # VMEM anyway, so this avoids keeping an [M, Cout] f32 tensor live across
    # conv1/GN1/SiLU/conv2/GN2.
    residual = jnp.dot(x_ref[...].reshape(M, Cin), wr_ref[...],
                       preferred_element_type=jnp.float32) + br

    out_ref[...] = _silu(h + residual).reshape(Bt, L, Cout)


def _vmem_capacity_bytes():
    try:
        cap = int(pltpu.get_tpu_info().vmem_capacity_bytes)
    except Exception:
        cap = 64 * 1024 * 1024            # conservative default (v7x-class)
    return max(cap, 32 * 1024 * 1024)


def _auto_block_b(B, L, Cin, Cout, in_bytes, budget_bytes):
    """Largest per-step batch tile whose rough VMEM footprint fits the budget."""
    block_b = 1
    for bt in (32, 16, 8, 4, 2, 1):
        m = bt * L
        blocks = 2 * (bt * L * Cin * in_bytes      # x block, double-buffered
                      + bt * L * Cout * 4          # out block, double-buffered
                      + bt * Cout * 4)             # emb block
        weights = 2 * ((4 * Cin + 3 * Cout) * Cout * in_bytes + 24 * Cout)
        live = m * Cout * (3 * in_bytes + 12) + m * Cin * in_bytes
        if blocks + weights + live <= budget_bytes:
            block_b = bt
            break
    # Keep >=2 grid steps when the batch allows it so both TensorCores of a
    # megacore part (v7x) get work; pass block_b explicitly to override.
    return max(1, min(block_b, -(-B // 2)))


def residual_block_1d(x_ncl, time_emb, text_emb, p, block_b=None,
                      mxu_dtype=jnp.bfloat16):
    """x_ncl: [B, Cin, L]; time_emb: [B, Tdim]; text_emb: [B, Xdim]."""
    B, Cin, L = x_ncl.shape
    Cout = p["b1"].shape[-1]
    f32 = jnp.float32
    assert Cout % GROUPS == 0, "GroupNorm(8, C) requires C divisible by 8"
    # L a multiple of 8 keeps the in-kernel (Bt, L, C) <-> (Bt*L, C) reshapes
    # layout-trivial (sublane tiles line up); otherwise they become relayouts.
    assert L % 8 == 0, "sequence length must be a multiple of 8"

    # time/text MLPs as one batched GEMM outside the kernel (M = B, not M = 1)
    emb = (time_emb @ p["wt"] + p["bt"]) + (text_emb @ p["wx"] + p["bx"])
    emb = emb[:, None, :].astype(f32)                            # [B, 1, Cout]

    # NCL -> NLC once in the wrapper; cast first so the transpose round trip
    # moves mxu_dtype (bf16) bytes, not f32.
    x = jnp.transpose(x_ncl.astype(mxu_dtype), (0, 2, 1))        # [B, L, Cin]

    # pack all per-channel vectors into one (8, Cout) tile -> single DMA
    pc = jnp.concatenate(
        [p["b1"], p["g1"], p["be1"], p["b2"], p["g2"], p["be2"], p["br"],
         jnp.zeros((1, Cout), f32)], axis=0).astype(f32)         # [8, Cout]

    # GroupNorm channel<->group one-hot maps, built once (hoisted out of kernel)
    ch = jnp.arange(Cout) // (Cout // GROUPS)
    c2g = (ch[:, None] == jnp.arange(GROUPS)[None, :]).astype(f32)  # [Cout, G]
    g2c = c2g.T                                                     # [G, Cout]

    w1 = p["w1"].astype(mxu_dtype)          # [3, Cin, Cout]
    w2 = p["w2"].astype(mxu_dtype)          # [3, Cout, Cout]
    wr = p["wr"].astype(mxu_dtype)          # [Cin, Cout]

    in_bytes = jnp.dtype(mxu_dtype).itemsize
    cap = _vmem_capacity_bytes()
    if block_b is None:
        block_b = _auto_block_b(B, L, Cin, Cout, in_bytes, cap // 3)
    Bt = max(1, min(block_b, B))
    Bp = ((B + Bt - 1) // Bt) * Bt
    if Bp != B:
        x = jnp.pad(x, ((0, Bp - B), (0, 0), (0, 0)))
        emb = jnp.pad(emb, ((0, Bp - B), (0, 0), (0, 0)))

    # NOTE: for production sizes prefer Cout a multiple of 128 (lane-dense
    # output stores); the demo shapes below are intentionally tiny.
    out = pl.pallas_call(
        resblock_kernel,
        out_shape=jax.ShapeDtypeStruct((Bp, L, Cout), f32),
        grid=(Bp // Bt,),
        in_specs=[
            pl.BlockSpec((Bt, L, Cin), lambda b: (b, 0, 0)),
            pl.BlockSpec((Bt, 1, Cout), lambda b: (b, 0, 0)),
            pl.BlockSpec((3, Cin, Cout), lambda b: (0, 0, 0)),
            pl.BlockSpec((3, Cout, Cout), lambda b: (0, 0, 0)),
            pl.BlockSpec((Cin, Cout), lambda b: (0, 0)),
            pl.BlockSpec((8, Cout), lambda b: (0, 0)),
            pl.BlockSpec((Cout, GROUPS), lambda b: (0, 0)),
            pl.BlockSpec((GROUPS, Cout), lambda b: (0, 0)),
        ],
        out_specs=pl.BlockSpec((Bt, L, Cout), lambda b: (b, 0, 0)),
        compiler_params=pltpu.CompilerParams(
            dimension_semantics=("parallel",),      # batch steps independent
            vmem_limit_bytes=int(min(cap * 3 // 4, 100 * 2**20))),
    )(x, emb, w1, w2, wr, pc, c2g, g2c)

    return jnp.transpose(out[:B], (0, 2, 1))         # back to [B, Cout, L]


def ref_forward(x_ncl, time_emb, text_emb, p):
    """Pure-JAX reference (same math as the PyTorch module in eval mode)."""
    x = jnp.transpose(x_ncl, (0, 2, 1))  # [B, L, Cin]

    def conv(xin, w, b):
        xp = jnp.pad(xin, ((0, 0), (1, 1), (0, 0)))
        return xp[:, :-2] @ w[0] + xp[:, 1:-1] @ w[1] + xp[:, 2:] @ w[2] + b

    def gn(h, gamma, beta):
        B, L, C = h.shape
        cg = C // GROUPS
        hg = h.reshape(B, L, GROUPS, cg)
        mean = hg.mean(axis=(1, 3), keepdims=True)
        var = hg.var(axis=(1, 3), keepdims=True)
        hn = ((hg - mean) / jnp.sqrt(var + EPS)).reshape(B, L, C)
        return hn * gamma + beta

    res = x @ p["wr"] + p["br"]
    h = gn(conv(x, p["w1"], p["b1"]), p["g1"], p["be1"])
    emb = (time_emb @ p["wt"] + p["bt"]) + (text_emb @ p["wx"] + p["bx"])
    h = jax.nn.silu(h + emb[:, None, :])
    h = gn(conv(h, p["w2"], p["b2"]), p["g2"], p["be2"])
    out = jax.nn.silu(h + res)
    return jnp.transpose(out, (0, 2, 1))


def make_params(key, Cin, Cout, Tdim, Xdim):
    ks = jax.random.split(key, 8)
    f32 = jnp.float32
    return {
        "w1": 0.1 * jax.random.normal(ks[0], (3, Cin, Cout), f32),
        "b1": 0.05 * jax.random.normal(ks[1], (1, Cout), f32),
        "w2": 0.1 * jax.random.normal(ks[2], (3, Cout, Cout), f32),
        "b2": 0.05 * jax.random.normal(ks[3], (1, Cout), f32),
        "g1": jnp.ones((1, Cout), f32) + 0.1,
        "be1": jnp.full((1, Cout), 0.02, f32),
        "g2": jnp.ones((1, Cout), f32) - 0.1,
        "be2": jnp.full((1, Cout), -0.02, f32),
        "wt": 0.1 * jax.random.normal(ks[4], (Tdim, Cout), f32),
        "bt": 0.05 * jax.random.normal(ks[5], (1, Cout), f32),
        "wx": 0.1 * jax.random.normal(ks[6], (Xdim, Cout), f32),
        "bx": 0.05 * jax.random.normal(ks[7], (1, Cout), f32),
        "wr": 0.1 * jax.random.normal(ks[0], (Cin, Cout), f32),
        "br": 0.05 * jax.random.normal(ks[1], (1, Cout), f32),
    }


if __name__ == "__main__":
    B, Cin, Cout, L = 6, 16, 32, 16
    Tdim, Xdim = 32, 48

    key = jax.random.PRNGKey(0)
    kx, kt, ks, kp = jax.random.split(key, 4)
    x = jax.random.normal(kx, (B, Cin, L), jnp.float32)        # [batch, channels, seq]
    time_emb = jax.random.normal(kt, (B, Tdim), jnp.float32)   # [batch, time_emb_dim]
    text_emb = jax.random.normal(ks, (B, Xdim), jnp.float32)   # [batch, text_emb_dim]
    params = make_params(kp, Cin, Cout, Tdim, Xdim)

    ref = ref_forward(x, time_emb, text_emb, params)

    # f32 MXU path, block_b=4: batch padded 6->8, grid=(2,) — exercises the
    # multi-sample-per-step and batch-padding paths with a tight tolerance.
    out32 = residual_block_1d(x, time_emb, text_emb, params,
                              block_b=4, mxu_dtype=jnp.float32)
    out32 = jax.block_until_ready(out32)
    assert out32.shape == (B, Cout, L)
    assert jnp.allclose(out32, ref, atol=2e-4, rtol=2e-4), "f32 mismatch vs reference"

    # Default bf16 MXU path with auto-sized tile + vmem_limit_bytes.
    out16 = residual_block_1d(x, time_emb, text_emb, params)
    out16 = jax.block_until_ready(out16)
    assert out16.shape == (B, Cout, L)
    assert jnp.allclose(out16, ref, atol=5e-2, rtol=5e-2), "bf16 mismatch vs reference"

    print("KERNEL_OK")
</pallas_src>

<mosaic_0001>
module attributes {stable_mosaic.version = 11 : i64} {
  func.func @resblock_kernel(%arg0: i32, %arg1: memref<4x16x16xf32, #tpu.memory_space<vmem>>, %arg2: memref<4x1x32xf32, #tpu.memory_space<vmem>>, %arg3: memref<3x16x32xf32, #tpu.memory_space<vmem>>, %arg4: memref<3x32x32xf32, #tpu.memory_space<vmem>>, %arg5: memref<16x32xf32, #tpu.memory_space<vmem>>, %arg6: memref<8x32xf32, #tpu.memory_space<vmem>>, %arg7: memref<32x8xf32, #tpu.memory_space<vmem>>, %arg8: memref<8x32xf32, #tpu.memory_space<vmem>>, %arg9: memref<4x16x32xf32, #tpu.memory_space<vmem>>) attributes {dimension_semantics = [#tpu.dimension_semantics<parallel>], iteration_bounds = array<i64: 2>, scalar_prefetch = 0 : i64, scratch_operands = 0 : i64, tpu.core_type = #tpu.core_type<tc>, window_params = [{transform_indices = @transform_0, window_bounds = array<i64: 4, 16, 16>}, {transform_indices = @transform_1, window_bounds = array<i64: 4, 1, 32>}, {pipeline_mode = #tpu.pipeline_mode<synchronous>, transform_indices = @transform_2, window_bounds = array<i64: 3, 16, 32>}, {pipeline_mode = #tpu.pipeline_mode<synchronous>, transform_indices = @transform_3, window_bounds = array<i64: 3, 32, 32>}, {pipeline_mode = #tpu.pipeline_mode<synchronous>, transform_indices = @transform_4, window_bounds = array<i64: 16, 32>}, {pipeline_mode = #tpu.pipeline_mode<synchronous>, transform_indices = @transform_5, window_bounds = array<i64: 8, 32>}, {pipeline_mode = #tpu.pipeline_mode<synchronous>, transform_indices = @transform_6, window_bounds = array<i64: 32, 8>}, {pipeline_mode = #tpu.pipeline_mode<synchronous>, transform_indices = @transform_7, window_bounds = array<i64: 8, 32>}, {transform_indices = @transform_8, window_bounds = array<i64: 4, 16, 32>}]} {
    %c0 = arith.constant 0 : index
    %c0_0 = arith.constant 0 : index
    %0 = vector.load %arg6[%c0, %c0_0] : memref<8x32xf32, #tpu.memory_space<vmem>>, vector<8x32xf32>
    %1 = vector.extract_strided_slice %0 {offsets = [0, 0], sizes = [1, 32], strides = [1, 1]} : vector<8x32xf32> to vector<1x32xf32>
    %2 = vector.extract_strided_slice %0 {offsets = [1, 0], sizes = [1, 32], strides = [1, 1]} : vector<8x32xf32> to vector<1x32xf32>
    %3 = vector.extract_strided_slice %0 {offsets = [2, 0], sizes = [1, 32], strides = [1, 1]} : vector<8x32xf32> to vector<1x32xf32>
    %4 = vector.extract_strided_slice %0 {offsets = [3, 0], sizes = [1, 32], strides = [1, 1]} : vector<8x32xf32> to vector<1x32xf32>
    %5 = vector.extract_strided_slice %0 {offsets = [4, 0], sizes = [1, 32], strides = [1, 1]} : vector<8x32xf32> to vector<1x32xf32>
    %6 = vector.extract_strided_slice %0 {offsets = [5, 0], sizes = [1, 32], strides = [1, 1]} : vector<8x32xf32> to vector<1x32xf32>
    %7 = vector.extract_strided_slice %0 {offsets = [6, 0], sizes = [1, 32], strides = [1, 1]} : vector<8x32xf32> to vector<1x32xf32>
    %c0_1 = arith.constant 0 : index
    %c0_2 = arith.constant 0 : index
    %8 = vector.load %arg7[%c0_1, %c0_2] : memref<32x8xf32, #tpu.memory_space<vmem>>, vector<32x8xf32>
    %c0_3 = arith.constant 0 : index
    %c0_4 = arith.constant 0 : index
    %9 = vector.load %arg8[%c0_3, %c0_4] : memref<8x32xf32, #tpu.memory_space<vmem>>, vector<8x32xf32>
    %10 = tpu.iota {dimensions = array<i32: 0>} : vector<64x1xi32>
    %c16_i32 = arith.constant 16 : i32
    %c0_i32 = arith.constant 0 : i32
    %11 = arith.cmpi eq, %c16_i32, %c0_i32 : i32
    %c1_i32 = arith.constant 1 : i32
    %12 = arith.select %11, %c1_i32, %c16_i32 : i32
    %13 = vector.broadcast %12 : i32 to vector<64x1xi32>
    %14 = arith.remsi %10, %13 : vector<64x1xi32>
    %c0_i32_5 = arith.constant 0 : i32
    %15 = vector.broadcast %c0_i32_5 : i32 to vector<64x1xi32>
    %16 = arith.cmpi ne, %14, %15 : vector<64x1xi32>
    %c0_i32_6 = arith.constant 0 : i32
    %17 = vector.broadcast %c0_i32_6 : i32 to vector<64x1xi32>
    %18 = arith.cmpi slt, %14, %17 : vector<64x1xi32>
    %c0_i32_7 = arith.constant 0 : i32
    %19 = arith.cmpi slt, %12, %c0_i32_7 : i32
    %20 = vector.broadcast %19 : i1 to vector<64x1xi1>
    %21 = vector.broadcast %20 : vector<64x1xi1> to vector<64x1xi1>
    %22 = arith.xori %18, %21 : vector<64x1xi1>
    %23 = arith.andi %22, %16 : vector<64x1xi1>
    %24 = vector.broadcast %12 : i32 to vector<64x1xi32>
    %25 = arith.addi %14, %24 : vector<64x1xi32>
    %26 = arith.select %23, %25, %14 : vector<64x1xi1>, vector<64x1xi32>
    %c0_i32_8 = arith.constant 0 : i32
    %27 = vector.broadcast %c0_i32_8 : i32 to vector<64x1xi32>
    %28 = arith.cmpi eq, %26, %27 : vector<64x1xi32>
    %c15_i32 = arith.constant 15 : i32
    %29 = vector.broadcast %c15_i32 : i32 to vector<64x1xi32>
    %30 = arith.cmpi eq, %26, %29 : vector<64x1xi32>
    %c0_9 = arith.constant 0 : index
    %c0_10 = arith.constant 0 : index
    %c0_11 = arith.constant 0 : index
    %31 = vector.load %arg1[%c0_9, %c0_10, %c0_11] : memref<4x16x16xf32, #tpu.memory_space<vmem>>, vector<4x16x16xf32>
    %32 = vector.shape_cast %31 : vector<4x16x16xf32> to vector<64x16xf32>
    %c1 = arith.constant 1 : index
    %c0_12 = arith.constant 0 : index
    %c0_13 = arith.constant 0 : index
    %33 = vector.load %arg3[%c1, %c0_12, %c0_13] : memref<3x16x32xf32, #tpu.memory_space<vmem>>, vector<1x16x32xf32>
    %34 = vector.shape_cast %33 : vector<1x16x32xf32> to vector<16x32xf32>
    %cst = arith.constant dense<0.000000e+00> : vector<64x32xf32>
    %35 = tpu.matmul %32, %34, %cst {dimension_numbers = #tpu.dot_dimension_numbers<[1], [0], [0], [1], [0, 0, 1, 1], [], []>} : vector<64x16xf32>, vector<16x32xf32>, vector<64x32xf32> -> vector<64x32xf32>
    %c0_14 = arith.constant 0 : index
    %c0_15 = arith.constant 0 : index
    %c0_16 = arith.constant 0 : index
    %36 = vector.load %arg3[%c0_14, %c0_15, %c0_16] : memref<3x16x32xf32, #tpu.memory_space<vmem>>, vector<1x16x32xf32>
    %37 = vector.shape_cast %36 : vector<1x16x32xf32> to vector<16x32xf32>
    %cst_17 = arith.constant dense<0.000000e+00> : vector<64x32xf32>
    %38 = tpu.matmul %32, %37, %cst_17 {dimension_numbers = #tpu.dot_dimension_numbers<[1], [0], [0], [1], [0, 0, 1, 1], [], []>} : vector<64x16xf32>, vector<16x32xf32>, vector<64x32xf32> -> vector<64x32xf32>
    %c1_i32_18 = arith.constant 1 : i32
    %39 = tpu.dynamic_rotate %38 by %c1_i32_18 dim 0 : vector<64x32xf32>, i32 -> vector<64x32xf32>
    %cst_19 = arith.constant 0.000000e+00 : f32
    %40 = vector.shape_cast %28 : vector<64x1xi1> to vector<64x1xi1>
    %41 = vector.broadcast %40 : vector<64x1xi1> to vector<64x32xi1>
    %42 = vector.broadcast %cst_19 : f32 to vector<64x32xf32>
    %43 = arith.select %41, %42, %39 : vector<64x32xi1>, vector<64x32xf32>
    %44 = arith.addf %35, %43 : vector<64x32xf32>
    %c2 = arith.constant 2 : index
    %c0_20 = arith.constant 0 : index
    %c0_21 = arith.constant 0 : index
    %45 = vector.load %arg3[%c2, %c0_20, %c0_21] : memref<3x16x32xf32, #tpu.memory_space<vmem>>, vector<1x16x32xf32>
    %46 = vector.shape_cast %45 : vector<1x16x32xf32> to vector<16x32xf32>
    %cst_22 = arith.constant dense<0.000000e+00> : vector<64x32xf32>
    %47 = tpu.matmul %32, %46, %cst_22 {dimension_numbers = #tpu.dot_dimension_numbers<[1], [0], [0], [1], [0, 0, 1, 1], [], []>} : vector<64x16xf32>, vector<16x32xf32>, vector<64x32xf32> -> vector<64x32xf32>
    %c63_i32 = arith.constant 63 : i32
    %48 = tpu.dynamic_rotate %47 by %c63_i32 dim 0 : vector<64x32xf32>, i32 -> vector<64x32xf32>
    %cst_23 = arith.constant 0.000000e+00 : f32
    %49 = vector.shape_cast %30 : vector<64x1xi1> to vector<64x1xi1>
    %50 = vector.broadcast %49 : vector<64x1xi1> to vector<64x32xi1>
    %51 = vector.broadcast %cst_23 : f32 to vector<64x32xf32>
    %52 = arith.select %50, %51, %48 : vector<64x32xi1>, vector<64x32xf32>
    %53 = arith.addf %44, %52 : vector<64x32xf32>
    %54 = vector.broadcast %1 : vector<1x32xf32> to vector<64x32xf32>
    %55 = arith.addf %53, %54 : vector<64x32xf32>
    %56 = vector.shape_cast %55 : vector<64x32xf32> to vector<4x16x32xf32>
    %cst_24 = arith.constant dense<0.000000e+00> : vector<4x32xf32>
    %57 = vector.multi_reduction <add>, %56, %cst_24 [1] : vector<4x16x32xf32> to vector<4x32xf32>
    %58 = arith.mulf %56, %56 : vector<4x16x32xf32>
    %cst_25 = arith.constant dense<0.000000e+00> : vector<4x32xf32>
    %59 = vector.multi_reduction <add>, %58, %cst_25 [1] : vector<4x16x32xf32> to vector<4x32xf32>
    %cst_26 = arith.constant dense<0.000000e+00> : vector<4x8xf32>
    %60 = tpu.matmul %57, %8, %cst_26 {dimension_numbers = #tpu.dot_dimension_numbers<[1], [0], [0], [1], [0, 0, 1, 1], [], []>} : vector<4x32xf32>, vector<32x8xf32>, vector<4x8xf32> -> vector<4x8xf32>
    %cst_27 = arith.constant 6.400000e+01 : f32
    %61 = vector.broadcast %cst_27 : f32 to vector<4x8xf32>
    %62 = arith.divf %60, %61 : vector<4x8xf32>
    %cst_28 = arith.constant dense<0.000000e+00> : vector<4x8xf32>
    %63 = tpu.matmul %59, %8, %cst_28 {dimension_numbers = #tpu.dot_dimension_numbers<[1], [0], [0], [1], [0, 0, 1, 1], [], []>} : vector<4x32xf32>, vector<32x8xf32>, vector<4x8xf32> -> vector<4x8xf32>
    %cst_29 = arith.constant 6.400000e+01 : f32
    %64 = vector.broadcast %cst_29 : f32 to vector<4x8xf32>
    %65 = arith.divf %63, %64 : vector<4x8xf32>
    %66 = arith.mulf %62, %62 : vector<4x8xf32>
    %67 = arith.subf %65, %66 : vector<4x8xf32>
    %cst_30 = arith.constant 0.000000e+00 : f32
    %68 = vector.broadcast %cst_30 : f32 to vector<4x8xf32>
    %69 = arith.maximumf %67, %68 : vector<4x8xf32>
    %cst_31 = arith.constant dense<0.000000e+00> : vector<4x32xf32>
    %70 = tpu.matmul %62, %9, %cst_31 {dimension_numbers = #tpu.dot_dimension_numbers<[1], [0], [0], [1], [0, 0, 1, 1], [], []>} : vector<4x8xf32>, vector<8x32xf32>, vector<4x32xf32> -> vector<4x32xf32>
    %cst_32 = arith.constant dense<0.000000e+00> : vector<4x32xf32>
    %71 = tpu.matmul %69, %9, %cst_32 {dimension_numbers = #tpu.dot_dimension_numbers<[1], [0], [0], [1], [0, 0, 1, 1], [], []>} : vector<4x8xf32>, vector<8x32xf32>, vector<4x32xf32> -> vector<4x32xf32>
    %cst_33 = arith.constant 9.99999974E-6 : f32
    %72 = vector.broadcast %cst_33 : f32 to vector<4x32xf32>
    %73 = arith.addf %71, %72 : vector<4x32xf32>
    %74 = math.rsqrt %73 : vector<4x32xf32>
    %75 = vector.shape_cast %70 : vector<4x32xf32> to vector<4x1x32xf32>
    %76 = vector.broadcast %75 : vector<4x1x32xf32> to vector<4x16x32xf32>
    %77 = arith.subf %56, %76 : vector<4x16x32xf32>
    %78 = vector.shape_cast %74 : vector<4x32xf32> to vector<4x1x32xf32>
    %79 = vector.broadcast %78 : vector<4x1x32xf32> to vector<4x16x32xf32>
    %80 = arith.mulf %77, %79 : vector<4x16x32xf32>
    %81 = vector.shape_cast %80 : vector<4x16x32xf32> to vector<64x32xf32>
    %82 = vector.broadcast %2 : vector<1x32xf32> to vector<64x32xf32>
    %83 = arith.mulf %81, %82 : vector<64x32xf32>
    %84 = vector.broadcast %3 : vector<1x32xf32> to vector<64x32xf32>
    %85 = arith.addf %83, %84 : vector<64x32xf32>
    %86 = vector.shape_cast %85 : vector<64x32xf32> to vector<4x16x32xf32>
    %c0_34 = arith.constant 0 : index
    %c0_35 = arith.constant 0 : index
    %c0_36 = arith.constant 0 : index
    %87 = vector.load %arg2[%c0_34, %c0_35, %c0_36] : memref<4x1x32xf32, #tpu.memory_space<vmem>>, vector<4x1x32xf32>
    %88 = vector.broadcast %87 : vector<4x1x32xf32> to vector<4x16x32xf32>
    %89 = arith.addf %86, %88 : vector<4x16x32xf32>
    %90 = vector.shape_cast %89 : vector<4x16x32xf32> to vector<64x32xf32>
    %91 = arith.negf %90 : vector<64x32xf32>
    %92 = math.exp %91 : vector<64x32xf32>
    %cst_37 = arith.constant 1.000000e+00 : f32
    %93 = vector.broadcast %cst_37 : f32 to vector<64x32xf32>
    %94 = arith.addf %93, %92 : vector<64x32xf32>
    %95 = arith.divf %93, %94 : vector<64x32xf32>
    %96 = arith.mulf %90, %95 : vector<64x32xf32>
    %c1_38 = arith.constant 1 : index
    %c0_39 = arith.constant 0 : index
    %c0_40 = arith.constant 0 : index
    %97 = vector.load %arg4[%c1_38, %c0_39, %c0_40] : memref<3x32x32xf32, #tpu.memory_space<vmem>>, vector<1x32x32xf32>
    %98 = vector.shape_cast %97 : vector<1x32x32xf32> to vector<32x32xf32>
    %cst_41 = arith.constant dense<0.000000e+00> : vector<64x32xf32>
    %99 = tpu.matmul %96, %98, %cst_41 {dimension_numbers = #tpu.dot_dimension_numbers<[1], [0], [0], [1], [0, 0, 1, 1], [], []>} : vector<64x32xf32>, vector<32x32xf32>, vector<64x32xf32> -> vector<64x32xf32>
    %c0_42 = arith.constant 0 : index
    %c0_43 = arith.constant 0 : index
    %c0_44 = arith.constant 0 : index
    %100 = vector.load %arg4[%c0_42, %c0_43, %c0_44] : memref<3x32x32xf32, #tpu.memory_space<vmem>>, vector<1x32x32xf32>
    %101 = vector.shape_cast %100 : vector<1x32x32xf32> to vector<32x32xf32>
    %cst_45 = arith.constant dense<0.000000e+00> : vector<64x32xf32>
    %102 = tpu.matmul %96, %101, %cst_45 {dimension_numbers = #tpu.dot_dimension_numbers<[1], [0], [0], [1], [0, 0, 1, 1], [], []>} : vector<64x32xf32>, vector<32x32xf32>, vector<64x32xf32> -> vector<64x32xf32>
    %c1_i32_46 = arith.constant 1 : i32
    %103 = tpu.dynamic_rotate %102 by %c1_i32_46 dim 0 : vector<64x32xf32>, i32 -> vector<64x32xf32>
    %cst_47 = arith.constant 0.000000e+00 : f32
    %104 = vector.shape_cast %28 : vector<64x1xi1> to vector<64x1xi1>
    %105 = vector.broadcast %104 : vector<64x1xi1> to vector<64x32xi1>
    %106 = vector.broadcast %cst_47 : f32 to vector<64x32xf32>
    %107 = arith.select %105, %106, %103 : vector<64x32xi1>, vector<64x32xf32>
    %108 = arith.addf %99, %107 : vector<64x32xf32>
    %c2_48 = arith.constant 2 : index
    %c0_49 = arith.constant 0 : index
    %c0_50 = arith.constant 0 : index
    %109 = vector.load %arg4[%c2_48, %c0_49, %c0_50] : memref<3x32x32xf32, #tpu.memory_space<vmem>>, vector<1x32x32xf32>
    %110 = vector.shape_cast %109 : vector<1x32x32xf32> to vector<32x32xf32>
    %cst_51 = arith.constant dense<0.000000e+00> : vector<64x32xf32>
    %111 = tpu.matmul %96, %110, %cst_51 {dimension_numbers = #tpu.dot_dimension_numbers<[1], [0], [0], [1], [0, 0, 1, 1], [], []>} : vector<64x32xf32>, vector<32x32xf32>, vector<64x32xf32> -> vector<64x32xf32>
    %c63_i32_52 = arith.constant 63 : i32
    %112 = tpu.dynamic_rotate %111 by %c63_i32_52 dim 0 : vector<64x32xf32>, i32 -> vector<64x32xf32>
    %cst_53 = arith.constant 0.000000e+00 : f32
    %113 = vector.shape_cast %30 : vector<64x1xi1> to vector<64x1xi1>
    %114 = vector.broadcast %113 : vector<64x1xi1> to vector<64x32xi1>
    %115 = vector.broadcast %cst_53 : f32 to vector<64x32xf32>
    %116 = arith.select %114, %115, %112 : vector<64x32xi1>, vector<64x32xf32>
    %117 = arith.addf %108, %116 : vector<64x32xf32>
    %118 = vector.broadcast %4 : vector<1x32xf32> to vector<64x32xf32>
    %119 = arith.addf %117, %118 : vector<64x32xf32>
    %120 = vector.shape_cast %119 : vector<64x32xf32> to vector<4x16x32xf32>
    %cst_54 = arith.constant dense<0.000000e+00> : vector<4x32xf32>
    %121 = vector.multi_reduction <add>, %120, %cst_54 [1] : vector<4x16x32xf32> to vector<4x32xf32>
    %122 = arith.mulf %120, %120 : vector<4x16x32xf32>
    %cst_55 = arith.constant dense<0.000000e+00> : vector<4x32xf32>
    %123 = vector.multi_reduction <add>, %122, %cst_55 [1] : vector<4x16x32xf32> to vector<4x32xf32>
    %cst_56 = arith.constant dense<0.000000e+00> : vector<4x8xf32>
    %124 = tpu.matmul %121, %8, %cst_56 {dimension_numbers = #tpu.dot_dimension_numbers<[1], [0], [0], [1], [0, 0, 1, 1], [], []>} : vector<4x32xf32>, vector<32x8xf32>, vector<4x8xf32> -> vector<4x8xf32>
    %cst_57 = arith.constant 6.400000e+01 : f32
    %125 = vector.broadcast %cst_57 : f32 to vector<4x8xf32>
    %126 = arith.divf %124, %125 : vector<4x8xf32>
    %cst_58 = arith.constant dense<0.000000e+00> : vector<4x8xf32>
    %127 = tpu.matmul %123, %8, %cst_58 {dimension_numbers = #tpu.dot_dimension_numbers<[1], [0], [0], [1], [0, 0, 1, 1], [], []>} : vector<4x32xf32>, vector<32x8xf32>, vector<4x8xf32> -> vector<4x8xf32>
    %cst_59 = arith.constant 6.400000e+01 : f32
    %128 = vector.broadcast %cst_59 : f32 to vector<4x8xf32>
    %129 = arith.divf %127, %128 : vector<4x8xf32>
    %130 = arith.mulf %126, %126 : vector<4x8xf32>
    %131 = arith.subf %129, %130 : vector<4x8xf32>
    %cst_60 = arith.constant 0.000000e+00 : f32
    %132 = vector.broadcast %cst_60 : f32 to vector<4x8xf32>
    %133 = arith.maximumf %131, %132 : vector<4x8xf32>
    %cst_61 = arith.constant dense<0.000000e+00> : vector<4x32xf32>
    %134 = tpu.matmul %126, %9, %cst_61 {dimension_numbers = #tpu.dot_dimension_numbers<[1], [0], [0], [1], [0, 0, 1, 1], [], []>} : vector<4x8xf32>, vector<8x32xf32>, vector<4x32xf32> -> vector<4x32xf32>
    %cst_62 = arith.constant dense<0.000000e+00> : vector<4x32xf32>
    %135 = tpu.matmul %133, %9, %cst_62 {dimension_numbers = #tpu.dot_dimension_numbers<[1], [0], [0], [1], [0, 0, 1, 1], [], []>} : vector<4x8xf32>, vector<8x32xf32>, vector<4x32xf32> -> vector<4x32xf32>
    %cst_63 = arith.constant 9.99999974E-6 : f32
    %136 = vector.broadcast %cst_63 : f32 to vector<4x32xf32>
    %137 = arith.addf %135, %136 : vector<4x32xf32>
    %138 = math.rsqrt %137 : vector<4x32xf32>
    %139 = vector.shape_cast %134 : vector<4x32xf32> to vector<4x1x32xf32>
    %140 = vector.broadcast %139 : vector<4x1x32xf32> to vector<4x16x32xf32>
    %141 = arith.subf %120, %140 : vector<4x16x32xf32>
    %142 = vector.shape_cast %138 : vector<4x32xf32> to vector<4x1x32xf32>
    %143 = vector.broadcast %142 : vector<4x1x32xf32> to vector<4x16x32xf32>
    %144 = arith.mulf %141, %143 : vector<4x16x32xf32>
    %145 = vector.shape_cast %144 : vector<4x16x32xf32> to vector<64x32xf32>
    %146 = vector.broadcast %5 : vector<1x32xf32> to vector<64x32xf32>
    %147 = arith.mulf %145, %146 : vector<64x32xf32>
    %148 = vector.broadcast %6 : vector<1x32xf32> to vector<64x32xf32>
    %149 = arith.addf %147, %148 : vector<64x32xf32>
    %c0_64 = arith.constant 0 : index
    %c0_65 = arith.constant 0 : index
    %c0_66 = arith.constant 0 : index
    %150 = vector.load %arg1[%c0_64, %c0_65, %c0_66] : memref<4x16x16xf32, #tpu.memory_space<vmem>>, vector<4x16x16xf32>
    %151 = vector.shape_cast %150 : vector<4x16x16xf32> to vector<64x16xf32>
    %c0_67 = arith.constant 0 : index
    %c0_68 = arith.constant 0 : index
    %152 = vector.load %arg5[%c0_67, %c0_68] : memref<16x32xf32, #tpu.memory_space<vmem>>, vector<16x32xf32>
    %cst_69 = arith.constant dense<0.000000e+00> : vector<64x32xf32>
    %153 = tpu.matmul %151, %152, %cst_69 {dimension_numbers = #tpu.dot_dimension_numbers<[1], [0], [0], [1], [0, 0, 1, 1], [], []>} : vector<64x16xf32>, vector<16x32xf32>, vector<64x32xf32> -> vector<64x32xf32>
    %154 = vector.broadcast %7 : vector<1x32xf32> to vector<64x32xf32>
    %155 = arith.addf %153, %154 : vector<64x32xf32>
    %156 = arith.addf %149, %155 : vector<64x32xf32>
    %157 = arith.negf %156 : vector<64x32xf32>
    %158 = math.exp %157 : vector<64x32xf32>
    %cst_70 = arith.constant 1.000000e+00 : f32
    %159 = vector.broadcast %cst_70 : f32 to vector<64x32xf32>
    %160 = arith.addf %159, %158 : vector<64x32xf32>
    %161 = arith.divf %159, %160 : vector<64x32xf32>
    %162 = arith.mulf %156, %161 : vector<64x32xf32>
    %163 = vector.shape_cast %162 : vector<64x32xf32> to vector<4x16x32xf32>
    %c0_71 = arith.constant 0 : index
    %c0_72 = arith.constant 0 : index
    %c0_73 = arith.constant 0 : index
    %164 = vector.load %arg9[%c0_71, %c0_72, %c0_73] : memref<4x16x32xf32, #tpu.memory_space<vmem>>, vector<4x16x32xf32>
    tpu.vector_store %arg9[%c0_71, %c0_72, %c0_73], %163 {strides = array<i32>} : memref<4x16x32xf32, #tpu.memory_space<vmem>>, vector<4x16x32xf32>,
    return
  }
  func.func @transform_0(%arg0: i32) -> (i32, i32, i32) {
    %c0_i32 = arith.constant 0 : i32
    %c0_i32_0 = arith.constant 0 : i32
    %c0_i32_1 = arith.constant 0 : i32
    return %arg0, %c0_i32, %c0_i32_0 : i32, i32, i32
  }
  func.func @transform_1(%arg0: i32) -> (i32, i32, i32) {
    %c0_i32 = arith.constant 0 : i32
    %c0_i32_0 = arith.constant 0 : i32
    %c0_i32_1 = arith.constant 0 : i32
    return %arg0, %c0_i32, %c0_i32_0 : i32, i32, i32
  }
  func.func @transform_2(%arg0: i32) -> (i32, i32, i32) {
    %c0_i32 = arith.constant 0 : i32
    %c0_i32_0 = arith.constant 0 : i32
    %c0_i32_1 = arith.constant 0 : i32
    %c0_i32_2 = arith.constant 0 : i32
    return %c0_i32, %c0_i32_0, %c0_i32_1 : i32, i32, i32
  }
  func.func @transform_3(%arg0: i32) -> (i32, i32, i32) {
    %c0_i32 = arith.constant 0 : i32
    %c0_i32_0 = arith.constant 0 : i32
    %c0_i32_1 = arith.constant 0 : i32
    %c0_i32_2 = arith.constant 0 : i32
    return %c0_i32, %c0_i32_0, %c0_i32_1 : i32, i32, i32
  }
  func.func @transform_4(%arg0: i32) -> (i32, i32) {
    %c0_i32 = arith.constant 0 : i32
    %c0_i32_0 = arith.constant 0 : i32
    %c0_i32_1 = arith.constant 0 : i32
    return %c0_i32, %c0_i32_0 : i32, i32
  }
  func.func @transform_5(%arg0: i32) -> (i32, i32) {
    %c0_i32 = arith.constant 0 : i32
    %c0_i32_0 = arith.constant 0 : i32
    %c0_i32_1 = arith.constant 0 : i32
    return %c0_i32, %c0_i32_0 : i32, i32
  }
  func.func @transform_6(%arg0: i32) -> (i32, i32) {
    %c0_i32 = arith.constant 0 : i32
    %c0_i32_0 = arith.constant 0 : i32
    %c0_i32_1 = arith.constant 0 : i32
    return %c0_i32, %c0_i32_0 : i32, i32
  }
  func.func @transform_7(%arg0: i32) -> (i32, i32) {
    %c0_i32 = arith.constant 0 : i32
    %c0_i32_0 = arith.constant 0 : i32
    %c0_i32_1 = arith.constant 0 : i32
    return %c0_i32, %c0_i32_0 : i32, i32
  }
  func.func @transform_8(%arg0: i32) -> (i32, i32, i32) {
    %c0_i32 = arith.constant 0 : i32
    %c0_i32_0 = arith.constant 0 : i32
    %c0_i32_1 = arith.constant 0 : i32
    return %arg0, %c0_i32, %c0_i32_0 : i32, i32, i32
  }
}

</mosaic_0001>

<bundles_post_ra>
// kernel: tpu_custom_call.1
= control target key start
LH: loop header
LB: loop body
LE: loop exit
PB: predicated region body
PF: predicated region fallthrough
CT: control target
= control target key end

     0   :  { %13 = vsyncpa [#allocation3], 0  ;;  %s4460_s0 = inlined_call_operand.hbm [shape: f32[8,16,16], index: 0, kind: input, shape index: {}]   ;;  %s4461_s1 = inlined_call_operand.vmem [shape: f32[8,1,32], index: 1, kind: input, shape index: {}]   ;;  %s4462_s2 = inlined_call_operand.hbm [shape: f32[3,16,32], index: 2, kind: input, shape index: {}]   ;;  %s4463_s3 = inlined_call_operand.hbm [shape: f32[3,32,32], index: 3, kind: input, shape index: {}]   ;;  %s4464_s4 = inlined_call_operand.vmem [shape: f32[16,32], index: 4, kind: input, shape index: {}]   ;;  %s4465_s5 = inlined_call_operand.vmem [shape: f32[8,32], index: 5, kind: input, shape index: {}]   ;;  %s4466_s6 = inlined_call_operand.vmem [shape: f32[32,8], index: 6, kind: input, shape index: {}]   ;;  %s4467_s7 = inlined_call_operand.vmem [shape: f32[8,32], index: 7, kind: input, shape index: {}]   ;;  %s4468_s8 = inlined_call_operand.hbm [shape: f32[8,16,32], index: 8, kind: output, shape index: {}]  }
   0x1   :  { %15 = vsyncpa [#allocation3 + $0x1], 0 }
   0x2   :  { %16 = vsyncpa [#allocation6], 0 }
   0x3   :  { %17 = vsyncpa [#allocation4], 0 }
   0x4   :  { %19 = vsyncpa [#allocation4 + $0x1], 0  ;;  %s3653_s27 = smov 0   ;;  %s3655_s28 = smov 0  }
   0x5   :  { %s3657_s29 = smov 0   ;;  %s3659_s30 = smov 0  }
   0x6 LB: > { %s3674_s9 = sadd.s32 4294967295, %s3594_s30   ;;  %s2818_s10 = sadd.s32 4294967294, %s3594_s30   ;;  %s3594_s30 = sphi %s3659_s30, %s4517_s30   ;;  %s3590_s29 = sphi %s3657_s29, %s4516_s29   ;;  %s3586_s28 = sphi %s3655_s28, %s4515_s28   ;;  %s3582_s27 = sphi %s3653_s27, %s4514_s27  }
   0x7   : > { %p45_p0 = scmp.ne.s32.totalorder %s3586_s28, %s3582_s27  ;;  %p4469_p1 = scmp.eq.s32.totalorder %s3674_s9, 0 }
   0x8   : > { %p227_p3 = scmp.eq.s32.totalorder %s2818_s10, 1  ;;  %p2819_p5 = scmp.ge.s32.totalorder %s3594_s30, 1 }
   0x9   : > { %p3683_p4 = por %p4469_p1, %p45_p0  ;;  %p234_p7 = scmp.lt.s32.totalorder %s3594_s30, 3 }
   0xa   : > { %p3688_p6 = por %p227_p3, %p45_p0  ;;  %s3596_s14 = smov [#allocation5]  }
   0xb   : > { %s4475_s11 = scalar_select %p3683_p4, 1, 0 }
   0xc   : > { %s4476_s12 = scalar_select %p3688_p6, 1, 0 }
   0xd   : > { %p3693_p8 = pnand %p2819_p5, %p234_p7  ;;  %s246_s15 = sshll.u32 %s3596_s14, 4  ;;  %s3697_s15 = int_to_ptr.vmem [resolvable:$true] %s246_s15 }
   0xe   : > { %s3597_s17 = smov [#allocation7]   ;;  %s3438_s21 = scalar_lea.hbm %s4462_s2, 768 }
   0xf   : > { %p3297_p9 = pneg %p3693_p8  ;;  %s259_s18 = sshll.u32 %s3597_s17, 4  ;;  %s3708_s18 = int_to_ptr.vmem [resolvable:$true] %s259_s18 }
  0x10   : > { %p3439_p12 = scmp.ne.s32.totalorder %s4462_s2, %s3438_s21  ;;  %p3445_p5 = scmp.lt.u32.totalorder %s3438_s21, %s4462_s2 }
  0x11   : > { %p3704_p11 = pnand %p3297_p9, %p4469_p1 }
  0x13   : > { %p3440_p13 = pneg %p3704_p11 }
  0x15   : > { %p3441_p0 = pnand %p3440_p13, %p3439_p12 }
  0x17   : > { %p3442_p3 = pneg %p3441_p0 }
  0x19   : > { %p3447_p7 = pnand %p3445_p5, %p3442_p3 }
  0x1b   : > { %3450 = shalt.err (!%p3447_p7)
}
  0x1c   : > { %s3451_s26 = scalar_lea.vmem %s3697_s15, 768  ;;  %p3459_p2 = scmp.lt.s32.totalorder %s3697_s15, %s3697_s15 }
  0x1d   : > { %p3452_p9 = scmp.ne.s32.totalorder %s3697_s15, %s3451_s26  ;;  %p3460_p12 = scmp.lt.s32.totalorder %s3451_s26, %s3451_s26 }
  0x1f   : > { %p3454_p10 = pnand %p3452_p9, %p3440_p13  ;;  %p3461_p0 = por %p3460_p12, %p3459_p2 }
  0x21   : > { %p3455_p1 = pneg %p3454_p10 }
  0x23   : > { %p3462_p6 = pnand %p3461_p0, %p3455_p1 }
  0x25   : > { %3465 = shalt.err (!%p3462_p6)
}
  0x26   : > { %s4470_s10 = smov 128   ;;  %s4471_s14 = smov 8  }
  0x27   : > { %3300 = dma.hbm_to_vmem [thread:$0]  (!%p3704_p11), %s4462_s2, 768, %s3697_s15, [#allocation6], %s4470_s10, %s4470_s10, %s4471_s14  }
  0x28   : > { %s3466_s22 = scalar_lea.hbm %s4463_s3, 1536 }
  0x29   : > { %p3467_p1 = scmp.ne.s32.totalorder %s4463_s3, %s3466_s22  ;;  %p3473_p10 = scmp.lt.u32.totalorder %s3466_s22, %s4463_s3 }
  0x2b   : > { %p3469_p2 = pnand %p3467_p1, %p3440_p13 }
  0x2d   : > { %p3470_p6 = pneg %p3469_p2 }
  0x2f   : > { %p3475_p3 = pnand %p3473_p10, %p3470_p6 }
  0x31   : > { %3478 = shalt.err (!%p3475_p3)
}
  0x32   : > { %s3479_s15 = scalar_lea.vmem %s3708_s18, 1536  ;;  %p3487_p12 = scmp.lt.s32.totalorder %s3708_s18, %s3708_s18 }
  0x33   : > { %p3480_p5 = scmp.ne.s32.totalorder %s3708_s18, %s3479_s15  ;;  %p3488_p0 = scmp.lt.s32.totalorder %s3479_s15, %s3479_s15 }
  0x35   : > { %p3482_p7 = pnand %p3480_p5, %p3440_p13  ;;  %p3489_p1 = por %p3488_p0, %p3487_p12 }
  0x37   : > { %p3483_p9 = pneg %p3482_p7 }
  0x39   : > { %p3490_p2 = pnand %p3489_p1, %p3483_p9 }
  0x3b   : > { %3493 = shalt.err (!%p3490_p2)
}
  0x3c   : > { %3303 = dma.hbm_to_vmem [thread:$0]  (!%p3704_p11), %s4463_s3, 1536, %s3708_s18, [#allocation6], %s4470_s10, %s4470_s10, %s4471_s14  }
  0x3d   : > { %s3769_s16 = sadd.s32 1, %s3594_s30   ;;  %s32_s20 = sadd.s32 1, %s3590_s29 }
  0x3e   : > { %s29_s21 = ssub.s32 %s3594_s30, %s3769_s16  ;;  %p39_p13 = scmp.ne.s32.totalorder %s3590_s29, %s3586_s28 }
  0x3f   : > { %p30_p6 = scmp.eq.s32.totalorder %s29_s21, 0  ;;  %p40_p10 = scmp.eq.s32.totalorder %s3594_s30, 0 }
  0x40   : > { %p4479_p3 = scmp.eq.s32.totalorder %s3674_s9, 1  ;;  %p3314_p7 = scmp.lt.s32.totalorder %s3594_s30, 2 }
  0x41   : > { %s3785_s23 = scalar_select %p30_p6, %s3590_s29, %s32_s20  }
  0x42   : > { %p3779_p5 = por %p4479_p3, %p39_p13  ;;  %p41_p9 = por %p40_p10, %p39_p13 }
  0x43   : > { %s285_s24 = sand.u32 1, %s3590_s29   ;;  %s2924_s18 = sshll.u32 %s3594_s30, 10 }
  0x44   : > { %s4480_s22 = scalar_select %p3779_p5, 1, 0 }
  0x45   : > { %s2823_s25 = sshll.u32 %s285_s24, 6  ;;  %s3792_s17 = scalar_lea.hbm %s4460_s0, %s2924_s18 }
  0x46   : > { %s289_s19 = scalar_lea.vmem [#allocation2], %s2823_s25  ;;  %p3796_p11 = pnand %p3314_p7, %p41_p9 }
  0x47   : > { %s297_s21 = sshll.u32 %s289_s19, 4  ;;  %s3800_s10 = scalar_lea.sflag [#allocation3], %s285_s24  ;;  %s3794_s21 = int_to_ptr.vmem [resolvable:$true] %s297_s21 }
  0x48   : > { %s3494_s14 = scalar_lea.hbm %s3792_s17, 1024  ;;  %p3496_p0 = pneg %p3796_p11 }
  0x49   : > { %p3495_p12 = scmp.ne.s32.totalorder %s3792_s17, %s3494_s14  ;;  %s3499_s26 = scalar_lea.hbm %s4460_s0, 2048 }
  0x4a   : > { %p3500_p13 = scmp.lt.u32.totalorder %s3792_s17, %s4460_s0  ;;  %p3501_p6 = scmp.lt.u32.totalorder %s3499_s26, %s3494_s14 }
  0x4b   : > { %p3497_p1 = pnand %p3496_p0, %p3495_p12  ;;  %p3503_p3 = scmp.lt.u32.totalorder %s3494_s14, %s3792_s17 }
  0x4c   : > { %p3502_p10 = por %p3501_p6, %p3500_p13 }
  0x4d   : > { %p3498_p2 = pneg %p3497_p1 }
  0x4e   : > { %p3504_p7 = por %p3503_p3, %p3502_p10 }
  0x50   : > { %p3505_p9 = pnand %p3504_p7, %p3498_p2 }
  0x52   : > { %3508 = shalt.err (!%p3505_p9)
}
  0x53   : > { %s3509_s24 = scalar_lea.vmem %s3794_s21, 1024  ;;  %s3600_s25 = smov [#allocation2]  }
  0x54   : > { %p3510_p12 = scmp.ne.s32.totalorder %s3794_s21, %s3509_s24  ;;  %s3514_s18 = sshll.u32 %s3600_s25, 4  ;;  %s3515_s18 = int_to_ptr.vmem [resolvable:$false] %s3514_s18 }
  0x55   : > { %s3516_s15 = scalar_lea.vmem %s3515_s18, 2048  ;;  %p3517_p4 = scmp.lt.s32.totalorder %s3794_s21, %s3515_s18 }
  0x56   : > { %p3512_p1 = pnand %p3510_p12, %p3496_p0  ;;  %p3518_p13 = scmp.lt.s32.totalorder %s3516_s15, %s3509_s24 }
  0x58   : > { %p3513_p5 = pneg %p3512_p1  ;;  %p3519_p6 = por %p3518_p13, %p3517_p4 }
  0x5a   : > { %p3520_p10 = pnand %p3519_p6, %p3513_p5 }
  0x5c   : > { %3523 = shalt.err (!%p3520_p10)
}
  0x5d   : > { %s4482_s14 = smov 8   ;;  %s4483_s26 = smov 128  }
  0x5e   : > { %3307 = dma.hbm_to_vmem [thread:$0]  (!%p3796_p11), %s3792_s17, 1024, %s3794_s21, %s3800_s10, %s4483_s26, %s4483_s26, %s4482_s14  }
  0x5f   : > { %317 = sbr.rel (%p3693_p8) target bundleno = 1652 (0x674), region = 52  ;;  %s3834_s19 = sand.u32 (!%p3693_p8), 1, %s3586_s28  }
  0x60   : > { %s2828_s24 = sshll.u32 (!%p3693_p8), %s3834_s19, 6  ;;  %s320_s25 = scalar_lea.sflag (!%p3693_p8), [#allocation3], %s3834_s19 }
  0x61   : > { %s3840_s20 = scalar_lea.vmem (!%p3693_p8), [#allocation2], %s2828_s24  ;;  %p4484_p4 = scmp.ne.s32.totalorder (!%p3693_p8), %s4475_s11, 0 }
  0x66   : > { %3569 = dma.done.wait (%p4484_p4), %s320_s25, 1024  }
  0x67   : > { %3571 = vsyncadd (%p4484_p4), %s320_s25, 4294966272  ;;  %p4485_p5 = scmp.eq.s32.totalorder %s3674_s9, 0 }
  0x69   : > { %3573 = dma.done.wait (%p4485_p5), [#allocation6], 2304   ;;  %p4486_p8 = pmov %p4485_p5 }
  0x6a   : > { %vm4474_vm0 = vcmask 130048   ;;  %v513_v0 = vld [vmem:[#allocation5] sm:$0xff]  ;;  %v514_v1 = vld [vmem:[#allocation5 + $0x8] sm:$0xff]  ;;  %v511_v8 = vld [vmem:[#allocation5 + $0x10] sm:$0xff]  ;;  %v3601_v22 = vmov 0.0|0.0   ;;  %vm3602_vm1 = vmmov 0   ;;  %v381_v26 = vlaneseq }
  0x6b   : > { %3575 = vsyncadd (%p4486_p8), [#allocation6], 4294964992  ;;  %v502_v2 = vld [vmem:[%s3840_s20] sm:$0xff]  ;;  %v3219_v3 = vpack.c.bf16 %v514_v1, %v513_v0  ;;  %v793_v6 = vld [vmem:[#allocation5 + $0x28] sm:$0xff]  ;;  %v3603_v23 = vmov 0.0   ;;  %vm960_vm8 = vcmask 261120  }
  0x6c   : > { %3035 = vmatprep.mubr.msk.f32.mxu0 %vm4474_vm0, %v502_v2  ;;  %v506_v4 = vld [vmem:[%s3840_s20 + $0x20] sm:$0xff]  ;;  %v512_v9 = vld [vmem:[#allocation5 + $0x18] sm:$0xff]  ;;  %v503_v10 = vld [vmem:[%s3840_s20 + $0x8] sm:$0xff]  ;;  %v3914_v27 = vshrl.u32 %v381_v26, 7  ;;  %vm1045_vm13 = vcmask 1041409   ;;  %vm1047_vm14 = vcmask 1042434  }
  0x6d   : > { %3041 = vmatprep.mubr.msk.f32.mxu1 %vm4474_vm0, %v506_v4  ;;  %v792_v5 = vld [vmem:[#allocation5 + $0x20] sm:$0xff]  ;;  %3220 = vmatprep.subr.bf16.mxu0 %v3219_v3  ;;  %v507_v11 = vld [vmem:[%s3840_s20 + $0x28] sm:$0xff]  ;;  %v3223_v12 = vpack.c.bf16 %v512_v9, %v511_v8  ;;  %v504_v13 = vld [vmem:[%s3840_s20 + $0x10] sm:$0xff]  ;;  %vm1049_vm15 = vcmask 1043459   ;;  %s2832_s10 = sshll.u32 %s3674_s9, 2  ;;  %s367_s17 = scalar_lea.vmem [#allocation8], %s2828_s24 }
  0x6e   : > { %3283 = vmatprep.subr.bf16.mxu1 %v3219_v3  ;;  %v3227_v7 = vpack.c.bf16 %v793_v6, %v792_v5  ;;  %3222 = vmatpush3.bf16.msra.mxu0 %v3219_v3  ;;  %v508_v14 = vld [vmem:[%s3840_s20 + $0x30] sm:$0xff]  ;;  %v505_v15 = vld [vmem:[%s3840_s20 + $0x18] sm:$0xff]  ;;  %v376_v17 = vld [vmem:[%s4466_s6] sm:$0xff]  ;;  %v384_v28 = vadd.s32 16, %v3914_v27  ;;  %vm653_vm2 = vcmp.lt.s32.totalorder %v3914_v27, 1  ;;  %v394_v35 = vand.u32 15, %v3914_v27 }
  0x6f   : > { %3284 = vmatpush3.bf16.msra.mxu1 %v3219_v3  ;;  %v509_v16 = vld [vmem:[%s3840_s20 + $0x38] sm:$0xff]  ;;  %v377_v18 = vld [vmem:[%s4466_s6 + $0x8] sm:$0xff]  ;;  %v378_v20 = vld [vmem:[%s4466_s6 + $0x10] sm:$0xff]  ;;  %v386_v39 = vadd.s32 32, %v3914_v27  ;;  %v383_v51 = vadd.s32 8, %v3914_v27  ;;  %v3940_v59 = vsub.s32 0, %v3914_v27 }
  0x70   : > { %3228 = vmatprep.subr.bf16.mxu0 %v3227_v7  ;;  %3224 = vmatprep.subr.bf16.mxu1 %v3223_v12  ;;  %v3888_v19 = vpack.c.bf16 %v377_v18, %v376_v17  ;;  %v379_v21 = vld [vmem:[%s4466_s6 + $0x18] sm:$0xff]  ;;  %v3911_v25 = vld [vmem:[%s4467_s7] sm:$0xff]  ;;  %v408_v38 = vand.u32 15, %v384_v28  ;;  %vm3924_vm3 = vcmp.eq.s32.totalorder %v394_v35, 0  ;;  %vm907_vm5 = vcmp.lt.s32.totalorder %v3914_v27, 7  ;;  %p370_p11 = scmp.lt.s32.totalorder %s2832_s10, 7 }
  0x71   : > { %3036 = vmatmul.mubr.msk.f32.vlgmr.msra.gmra.mrb[0].mxu0 %vm4474_vm0, %v503_v10  ;;  %v3900_v24 = vpack.c.bf16 %v379_v21, %v378_v20  ;;  %v422_v54 = vand.u32 15, %v386_v39  ;;  %v3949_v1 = vld [vmem:[%s4465_s5] sm:$0xff]  ;;  %v401_v6 = vand.u32 15, %v383_v51  ;;  %v385_v8 = vadd.s32 24, %v3914_v27  ;;  %s2926_s21 = sshll.u32 %s3674_s9, 10  ;;  %s2703_s9 = scalar_lea.sflag [#allocation4], %s3834_s19 }
  0x72   : > { %3042 = vmatmul.mubr.msk.f32.vlgmr.msra.gmra.mrb[0].mxu1 %vm4474_vm0, %v507_v11  ;;  %3230 = vmatpush3.bf16.msra.mxu0 %v3227_v7  ;;  %vm3931_vm4 = vcmp.eq.s32.totalorder %v408_v38, 0  ;;  %v388_v9 = vadd.s32 48, %v3914_v27  ;;  %s4519_s10 = smov (!%p370_p11, %s2832_s10), 7  ;;  %s4411_s14 = scalar_lea.hbm %s4468_s8, %s2926_s21 }
  0x73   : > { %3038 = vmatprep.mubr.msk.f32.mxu0 %vm4474_vm0, %v504_v13  ;;  %3044 = vmatprep.mubr.msk.f32.mxu1 %vm4474_vm0, %v508_v14  ;;  %vm3971_vm6 = vcmp.eq.s32.totalorder %v401_v6, 15  ;;  %vm3975_vm7 = vcmp.eq.s32.totalorder %v422_v54, 0  ;;  %s4138_s18 = scalar_lea.vmem %s4461_s1, %s4519_s10  ;;  %p4511_p2 = scmp.ne.s32.totalorder %s4480_s22, 0 }
  0x74   : > { %3226 = vmatpush3.bf16.msra.mxu1 %v3223_v12  ;;  %3106 = vmatprep.subr.mxu0 %v3603_v23  ;;  %s3605_s25 = smov [#allocation8]  }
  0x75   : > { %3039 = vmatmul.mubr.msk.f32.gmra.mrb[2].mxu0 %vm4474_vm0, %v505_v15  ;;  %3231 = vmatprep.subr.bf16.mxu1 %v3601_v22  ;;  %s3528_s11 = sshll.u32 %s3605_s25, 4  ;;  %s3529_s11 = int_to_ptr.vmem [resolvable:$false] %s3528_s11 }
  0x76   : > { %3045 = vmatmul.mubr.msk.f32.gmra.mrb[2].mxu1 %vm4474_vm0, %v509_v16  ;;  %3067 = vmatprep.mubr.msk.f32.mxu0 %vm4474_vm0, %v502_v2  ;;  %s3530_s13 = scalar_lea.vmem %s3529_s11, 2048 }
  0x77   : > { %3051 = vmatprep.mubr.msk.f32.mxu1 %vm4474_vm0, %v502_v2 }
  0x79   : > { %3068 = vmatmul.mubr.msk.f32.vlgmr.msra.gmra.mrb[4].mxu0 %vm4474_vm0, %v503_v10 }
  0x7a   : > { %3052 = vmatmul.mubr.msk.f32.vlgmr.msra.gmra.mrb[4].mxu1 %vm4474_vm0, %v503_v10  ;;  %3070 = vmatprep.mubr.msk.f32.mxu0 %vm4474_vm0, %v504_v13 }
  0x7b   : > { %3054 = vmatprep.mubr.msk.f32.mxu1 %vm4474_vm0, %v504_v13  ;;  %3233 = vmatpush3.bf16.msra.mxu1 %v3888_v19 }
  0x7c   : > { %3234 = vmatprep.subr.bf16.mxu1 %v3601_v22  ;;  %3107 = vmatpush3.msra.mxu0 %v3911_v25 }
  0x7d   : > { %3071 = vmatmul.mubr.msk.f32.gmra.mrb[6].mxu0 %vm4474_vm0, %v505_v15 }
  0x7e   : > { %3055 = vmatmul.mubr.msk.f32.gmra.mrb[6].mxu1 %vm4474_vm0, %v505_v15  ;;  %3073 = vmatprep.mubr.msk.f32.mxu0 %vm4474_vm0, %v506_v4 }
  0x7f   : > { %3057 = vmatprep.mubr.msk.f32.mxu1 %vm4474_vm0, %v506_v4  ;;  %3236 = vmatpush3.bf16.msra.mxu1 %v3900_v24 }
  0x80   : > { %3237 = vmatprep.subr.bf16.mxu1 %v3601_v22 }
  0x81   : > { %3074 = vmatmul.mubr.msk.f32.gmra.mrb[8].mxu0 %vm4474_vm0, %v507_v11 }
  0x82   : > { %3058 = vmatmul.mubr.msk.f32.gmra.mrb[8].mxu1 %vm4474_vm0, %v507_v11  ;;  %3076 = vmatprep.mubr.msk.f32.mxu0 %vm4474_vm0, %v508_v14  ;;  %v3967_v11 = vrot.slane %v3949_v1, %v3940_v59 }
  0x83   : > { %3060 = vmatprep.mubr.msk.f32.mxu1 %vm4474_vm0, %v508_v14 }
  0x85   : > { %3077 = vmatmul.mubr.msk.f32.gmra.mrb[10].mxu0 %vm4474_vm0, %v509_v16 }
  0x86   : > { %3061 = vmatmul.mubr.msk.f32.gmra.mrb[10].mxu1 %vm4474_vm0, %v509_v16  ;;  %3108 = vmatprep.mubr.msk.f32.mxu0 %vm3602_vm1, %v3603_v23  ;;  %vm1208_vm0 = vcmask 64512  }
  0x87   : > { %3087 = vmatprep.mubr.msk.f32.mxu1 %vm3602_vm1, %v3603_v23 }
 0x144   : > { %v3037_v29 = vpop.f32.mrb[0].mxu0 }
 0x145   : > { %v3043_v30 = vpop.f32.mrb[0].mxu1  ;;  %v646_v31 = vrot.slane %v3037_v29, 7  ;;  %v606_v32 = vpop.f32.mrb[1].mxu0  ;;  %v1989_v29 = vsub.s32 3, %v3914_v27 }
 0x146   : > { %v650_v33 = vrot.slane %v3043_v30, 7  ;;  %v626_v34 = vpop.f32.mrb[1].mxu1  ;;  %v645_v36 = vrot.slane %v606_v32, 7  ;;  %v415_v30 = vand.u32 15, %v385_v8 }
 0x147   : > { %v649_v37 = vrot.slane %v626_v34, 7 }
 0x148   : > { %v3040_v40 = vpop.f32.mrb[2].mxu0  ;;  %v660_v42 = vsel %vm653_vm2, %v645_v36, %v646_v31  ;;  %vm3992_vm9 = vcmp.eq.s32.totalorder %v415_v30, 15 }
 0x149   : > { %v3046_v41 = vpop.f32.mrb[2].mxu1  ;;  %v656_v43 = vsel %vm653_vm2, %v649_v37, %v650_v33  ;;  %v648_v44 = vrot.slane %v3040_v40, 7  ;;  %v616_v46 = vpop.f32.mrb[3].mxu0 }
 0x14a   : > { %v652_v45 = vrot.slane %v3046_v41, 7  ;;  %v636_v47 = vpop.f32.mrb[3].mxu1  ;;  %v647_v49 = vrot.slane %v616_v46, 7 }
 0x14b   : > { %v651_v50 = vrot.slane %v636_v47, 7  ;;  %v657_v55 = vsel %vm653_vm2, %v648_v44, %v649_v37  ;;  %v387_v37 = vadd.s32 40, %v3914_v27 }
 0x14c   : > { %v661_v52 = vsel %vm653_vm2, %v652_v45, %v645_v36  ;;  %v3069_v57 = vpop.f32.mrb[4].mxu0  ;;  %v658_v60 = vsel %vm653_vm2, %v647_v49, %v648_v44  ;;  %v659_v61 = vsel %vm653_vm2, %v646_v31, %v647_v49  ;;  %v436_v31 = vand.u32 15, %v388_v9 }
 0x14d   : > { %v3053_v56 = vpop.f32.mrb[4].mxu1  ;;  %v678_v58 = vsel %vm3924_vm3, 0.0, %v661_v52  ;;  %v900_v63 = vrot.slane %v3069_v57, 1  ;;  %v3951_v2 = vpop.f32.mrb[5].mxu0  ;;  %v654_v3 = vsel %vm653_vm2, %v651_v50, %v652_v45  ;;  %v655_v7 = vsel %vm653_vm2, %v650_v33, %v651_v50 }
 0x14e   : > { %v758_v62 = vadd.f32 %v3053_v56, %v660_v42  ;;  %v752_v0 = vpop.f32.mrb[5].mxu1  ;;  %v899_v5 = vrot.slane %v3951_v2, 1  ;;  %v680_v17 = vsel %vm3931_vm4, 0.0, %v659_v61  ;;  %v389_v36 = vadd.s32 56, %v3914_v27 }
 0x14f   : > { %v753_v4 = vadd.f32 %v752_v0, %v678_v58  ;;  %v682_v41 = vsel %vm3975_vm7, 0.0, %v657_v55  ;;  %vm3996_vm10 = vcmp.eq.s32.totalorder %v436_v31, 0  ;;  %v429_v58 = vand.u32 15, %v387_v37 }
 0x150   : > { %v914_v10 = vsel %vm907_vm5, %v899_v5, %v900_v63  ;;  %v3072_v13 = vpop.f32.mrb[6].mxu0  ;;  %v443_v57 = vand.u32 15, %v389_v36 }
 0x151   : > { %v3056_v12 = vpop.f32.mrb[6].mxu1  ;;  %v940_v14 = vadd.f32 %v914_v10, %v753_v4  ;;  %v902_v16 = vrot.slane %v3072_v13, 1  ;;  %v870_v20 = vpop.f32.mrb[7].mxu0  ;;  %vm4037_vm12 = vcmp.eq.s32.totalorder %v429_v58, 15 }
 0x152   : > { %v768_v15 = vadd.f32 %v3056_v12, %v658_v60  ;;  %v762_v18 = vpop.f32.mrb[7].mxu1  ;;  %v901_v28 = vrot.slane %v870_v20, 1  ;;  %vm4027_vm11 = vcmp.eq.s32.totalorder %v443_v57, 15 }
 0x153   : > { %v763_v21 = vadd.f32 %v762_v18, %v680_v17  ;;  %v3986_v38 = vadd.f32 %v3967_v11, %v940_v14  ;;  %v684_v17 = vsel %vm3996_vm10, 0.0, %v655_v7 }
 0x154   : > { %v912_v32 = vsel %vm907_vm5, %v901_v28, %v902_v16  ;;  %v913_v33 = vsel %vm907_vm5, %v900_v63, %v901_v28  ;;  %v3075_v35 = vpop.f32.mrb[8].mxu0 }
 0x155   : > { %v3059_v34 = vpop.f32.mrb[8].mxu1  ;;  %v933_v39 = vsel %vm3971_vm6, 0.0, %v913_v33  ;;  %v942_v40 = vadd.f32 %v912_v32, %v763_v21  ;;  %v880_v44 = vpop.f32.mrb[9].mxu0  ;;  %v904_v47 = vrot.slane %v3075_v35, 1  ;;  %v961_v60 = vsel %vm960_vm8, %v3986_v38, 0.0 }
 0x156   : > { %v772_v42 = vpop.f32.mrb[9].mxu1  ;;  %v941_v45 = vadd.f32 %v933_v39, %v758_v62  ;;  %v778_v46 = vadd.f32 %v3059_v34, %v656_v43  ;;  %v903_v51 = vrot.slane %v880_v44, 1  ;;  %v997_v61 = vmul.f32 %v3986_v38, %v3986_v38 }
 0x157   : > { %v773_v49 = vadd.f32 %v772_v42, %v682_v41  ;;  %v4004_v55 = vadd.f32 %v3967_v11, %v942_v40 }
 0x158   : > { %v4001_v54 = vadd.f32 %v3967_v11, %v941_v45  ;;  %v3078_v43 = vpop.f32.mrb[10].mxu0  ;;  %v910_v62 = vsel %vm907_vm5, %v903_v51, %v904_v47  ;;  %v911_v63 = vsel %vm907_vm5, %v902_v16, %v903_v51  ;;  %v1005_v31 = vsel %vm960_vm8, %v997_v61, 0.0 }
 0x159   : > { %v3062_v56 = vpop.f32.mrb[10].mxu1  ;;  %v890_v4 = vpop.f32.mrb[11].mxu0  ;;  %v935_v9 = vsel %vm3992_vm9, 0.0, %v911_v63  ;;  %v944_v10 = vadd.f32 %v910_v62, %v773_v49  ;;  %v999_v16 = vmul.f32 %v4004_v55, %v4004_v55  ;;  %v906_v18 = vrot.slane %v3078_v43, 1 }
 0x15a   : > { %v782_v0 = vpop.f32.mrb[11].mxu1  ;;  %v962_v6 = vsel %vm960_vm8, %v4001_v54, 0.0  ;;  %v998_v8 = vmul.f32 %v4001_v54, %v4001_v54  ;;  %v943_v13 = vadd.f32 %v935_v9, %v768_v15  ;;  %v788_v14 = vadd.f32 %v3062_v56, %v654_v3 }
 0x15b   : > { %v963_v12 = vadd.f32 %v962_v6, %v961_v60  ;;  %v783_v20 = vadd.f32 %v782_v0, %v684_v17  ;;  %v905_v30 = vrot.slane %v890_v4, 1  ;;  %v915_v7 = vsel %vm907_vm5, %v906_v18, %v899_v5 }
 0x15c   : > { %v4025_v21 = vadd.f32 %v3967_v11, %v943_v13  ;;  %v1006_v3 = vsel %vm960_vm8, %v998_v8, 0.0  ;;  %v970_v33 = vsel %vm960_vm8, %v4004_v55, 0.0  ;;  %v1014_v36 = vsel %vm960_vm8, %v999_v16, 0.0 }
 0x15d   : > { %v964_v32 = vrot.slane %v963_v12, 4  ;;  %v939_v5 = vsel %vm4027_vm11, 0.0, %v915_v7  ;;  %v908_v37 = vsel %vm907_vm5, %v905_v30, %v906_v18  ;;  %v1007_v39 = vadd.f32 %v1006_v3, %v1005_v31 }
 0x15e   : > { %v971_v34 = vsel %vm960_vm8, %v4025_v21, 0.0  ;;  %v1000_v35 = vmul.f32 %v4025_v21, %v4025_v21  ;;  %v4053_v40 = vadd.f32 %v3967_v11, %v944_v10  ;;  %v947_v42 = vadd.f32 %v939_v5, %v788_v14 }
 0x15f   : > { %v972_v2 = vadd.f32 %v971_v34, %v970_v33  ;;  %v909_v49 = vsel %vm907_vm5, %v904_v47, %v905_v30  ;;  %v946_v51 = vadd.f32 %v908_v37, %v783_v20  ;;  %v965_v56 = vadd.f32 %v964_v32, %v963_v12 }
 0x160   : > { %v1015_v41 = vsel %vm960_vm8, %v1000_v35, 0.0  ;;  %v4059_v57 = vadd.f32 %v3967_v11, %v947_v42  ;;  %v937_v43 = vsel %vm4037_vm12, 0.0, %v909_v49  ;;  %v1001_v63 = vmul.f32 %v4053_v40, %v4053_v40 }
 0x161   : > { %v973_v44 = vrot.slane %v972_v2, 4  ;;  %v1016_v45 = vadd.f32 %v1015_v41, %v1014_v36  ;;  %v945_v61 = vadd.f32 %v937_v43, %v778_v46  ;;  %v4064_v62 = vadd.f32 %v3967_v11, %v946_v51 }
 0x162   : > { %v989_v47 = vsel %vm960_vm8, %v4059_v57, 0.0  ;;  %v1004_v0 = vmul.f32 %v4059_v57, %v4059_v57  ;;  %v1008_v4 = vrot.slane %v1007_v39, 4  ;;  %v979_v9 = vsel %vm960_vm8, %v4053_v40, 0.0 }
 0x163   : > { %v974_v58 = vadd.f32 %v973_v44, %v972_v2  ;;  %v1017_v60 = vrot.slane %v1016_v45, 4  ;;  %v4073_v8 = vadd.f32 %v3967_v11, %v945_v61  ;;  %v988_v46 = vsel %vm960_vm8, %v4064_v62, 0.0 }
 0x164   : > { %v1033_v10 = vsel %vm960_vm8, %v1004_v0, 0.0  ;;  %v990_v12 = vadd.f32 %v989_v47, %v988_v46  ;;  %v1003_v13 = vmul.f32 %v4064_v62, %v4064_v62  ;;  %v966_v14 = vrot.slane %v965_v56, 2 }
 0x165   : > { %v975_v6 = vrot.slane %v974_v58, 2  ;;  %v1018_v17 = vadd.f32 %v1017_v60, %v1016_v45  ;;  %v980_v16 = vsel %vm960_vm8, %v4073_v8, 0.0  ;;  %v1002_v11 = vmul.f32 %v4073_v8, %v4073_v8 }
 0x166   : > { %v1023_v18 = vsel %vm960_vm8, %v1001_v63, 0.0  ;;  %v981_v20 = vadd.f32 %v980_v16, %v979_v9  ;;  %v991_v30 = vrot.slane %v990_v12, 4  ;;  %v1032_v31 = vsel %vm960_vm8, %v1003_v13, 0.0 }
 0x167   : > { %v1009_v3 = vadd.f32 %v1008_v4, %v1007_v39  ;;  %v976_v7 = vadd.f32 %v975_v6, %v974_v58  ;;  %v1024_v32 = vsel %vm960_vm8, %v1002_v11, 0.0  ;;  %v1034_v33 = vadd.f32 %v1033_v10, %v1032_v31 }
 0x168   : > { %v982_v34 = vrot.slane %v981_v20, 4  ;;  %v992_v35 = vadd.f32 %v991_v30, %v990_v12  ;;  %v1025_v36 = vadd.f32 %v1024_v32, %v1023_v18  ;;  %v967_v2 = vadd.f32 %v966_v14, %v965_v56 }
 0x169   : > { %v1019_v5 = vrot.slane %v1018_v17, 2  ;;  %v1035_v37 = vrot.slane %v1034_v33, 4  ;;  %v977_v45 = vrot.slane %v976_v7, 1  ;;  %v1010_v49 = vrot.slane %v1009_v3, 2 }
 0x16a   : > { %v983_v41 = vadd.f32 %v982_v34, %v981_v20  ;;  %v993_v42 = vrot.slane %v992_v35, 2  ;;  %v1026_v44 = vrot.slane %v1025_v36, 4  ;;  %v968_v39 = vrot.slane %v967_v2, 1 }
 0x16b   : > { %v1036_v51 = vadd.f32 %v1035_v37, %v1034_v33  ;;  %v1020_v58 = vadd.f32 %v1019_v5, %v1018_v17  ;;  %v978_v0 = vadd.f32 %v977_v45, %v976_v7  ;;  %v1011_v6 = vadd.f32 %v1010_v49, %v1009_v3 }
 0x16c   : > { %v984_v43 = vrot.slane %v983_v41, 2  ;;  %v994_v60 = vadd.f32 %v993_v42, %v992_v35  ;;  %v1027_v61 = vadd.f32 %v1026_v44, %v1025_v36  ;;  %v969_v10 = vadd.f32 %v968_v39, %v967_v2 }
 0x16d   : > { %v1037_v46 = vrot.slane %v1036_v51, 2  ;;  %v1021_v12 = vrot.slane %v1020_v58, 1  ;;  %v1012_v18 = vrot.slane %v1011_v6, 1 }
 0x16e   : > { %v985_v63 = vadd.f32 %v984_v43, %v983_v41  ;;  %v1028_v47 = vrot.slane %v1027_v61, 2  ;;  %v995_v4 = vrot.slane %v994_v60, 1  ;;  %v1046_v11 = vsel %vm1045_vm13, %v978_v0, %v969_v10  ;;  %v1583_v43 = vld [vmem:[#allocation7] sm:$0xff]  ;;  %v1847_v10 = vld [vmem:[#allocation7 + $0x48] sm:$0xff] }
 0x16f   : > { %v1038_v17 = vadd.f32 %v1037_v46, %v1036_v51  ;;  %v1022_v31 = vadd.f32 %v1021_v12, %v1020_v58  ;;  %v1013_v7 = vadd.f32 %v1012_v18, %v1011_v6  ;;  %v1580_v58 = vld [vmem:[#allocation7 + $0x28] sm:$0xff]  ;;  %v1581_v6 = vld [vmem:[#allocation7 + $0x30] sm:$0xff]  ;;  %v1582_v46 = vld [vmem:[#allocation7 + $0x38] sm:$0xff] }
 0x170   : > { %v986_v56 = vrot.slane %v985_v63, 1  ;;  %v1029_v9 = vadd.f32 %v1028_v47, %v1027_v61  ;;  %v996_v16 = vadd.f32 %v995_v4, %v994_v60  ;;  %v1584_v60 = vld [vmem:[#allocation7 + $0x8] sm:$0xff]  ;;  %v1579_v61 = vld [vmem:[#allocation7 + $0x20] sm:$0xff]  ;;  %v1586_v47 = vld [vmem:[#allocation7 + $0x18] sm:$0xff] }
 0x171   : > { %v1039_v32 = vrot.slane %v1038_v17, 1  ;;  %v1129_v33 = vsel %vm1045_vm13, %v1022_v31, %v1013_v7  ;;  %v3243_v39 = vpack.c.bf16 %v1584_v60, %v1583_v43  ;;  %v3251_v0 = vpack.c.bf16 %v1580_v58, %v1579_v61 }
 0x172   : > { %v987_v13 = vadd.f32 %v986_v56, %v985_v63  ;;  %v1030_v14 = vrot.slane %v1029_v9, 1  ;;  %v1585_v63 = vld [vmem:[#allocation7 + $0x10] sm:$0xff]  ;;  %v3255_v56 = vpack.c.bf16 %v1582_v46, %v1581_v6 }
 0x173   : > { %v1040_v35 = vadd.f32 %v1039_v32, %v1038_v17  ;;  %v3247_v4 = vpack.c.bf16 %v1586_v47, %v1585_v63  ;;  %3252 = vmatprep.subr.bf16.mxu0 %v3251_v0 }
 0x174   : > { %v1048_v20 = vsel %vm1047_vm14, %v987_v13, %v1046_v11  ;;  %v1031_v3 = vadd.f32 %v1030_v14, %v1029_v9  ;;  %v1846_v9 = vld [vmem:[#allocation7 + $0x40] sm:$0xff]  ;;  %v3604_v14 = vmov 1966171168  }
 0x175   : > { %v1050_v30 = vsel %vm1049_vm15, %v996_v16, %v1048_v20  ;;  %v4109_v12 = vpack.c.bf16 %v1847_v10, %v1846_v9  ;;  %v1358_v16 = vunpack.c.l.s4 %v3604_v14 }
 0x176   : > { %3088 = vmatmul.mubr.msk.f32.vlgmr.msra.gmra.mrb[12].mxu1 %vm960_vm8, %v1050_v30  ;;  %v1130_v34 = vsel %vm1047_vm14, %v1031_v3, %v1129_v33 }
 0x177   : > { %3239 = vmatpush3.bf16.msra.mxu1 %v3888_v19  ;;  %3098 = vmatprep.mubr.msk.f32.mxu1 %vm3602_vm1, %v3603_v23  ;;  %v1131_v36 = vsel %vm1049_vm15, %v1040_v35, %v1130_v34  ;;  %v1359_v18 = vunpack.c.0.s8 %v1358_v16 }
 0x178   : > { %3240 = vmatprep.subr.bf16.mxu1 %v3601_v22 }
 0x179   : > { %v4113_v17 = vsub.s32 %v1359_v18, %v3914_v27  ;;  %v2861_v18 = vld [vmem:[%s4138_s18] ss:$0 sm:$0xff] }
 0x17b   : > { %3242 = vmatpush3.bf16.msra.mxu1 %v3900_v24 }
 0x17c   : > { %3101 = vmatprep.subr.mxu1 %v3603_v23 }
 0x17e   : > { %3099 = vmatmul.mubr.msk.f32.vlgmr.msra.gmra.mrb[14].mxu1 %vm960_vm8, %v1131_v36 }
 0x17f   : > { %3102 = vmatpush3.msra.mxu1 %v3911_v25  ;;  %3103 = vmatprep.mubr.msk.f32.mxu1 %vm3602_vm1, %v3603_v23 }
 0x180   : > { %3244 = vmatprep.subr.bf16.mxu1 %v3243_v39 }
 0x249   : > { %v1119_v2 = vpop.f32.mrb[12].mxu1 }
 0x24a   : > { %v1124_v5 = vmul.f32 0.015625, %v1119_v2  ;;  %v3089_v37 = vpop.f32.mrb[13].mxu1 }
 0x24c   : > { %3104 = vmatmul.mubr.msk.f32.vlgmr.msra.gmra.mrb[16].mxu1 %vm1208_vm0, %v1124_v5  ;;  %v1205_v42 = vmul.f32 %v1124_v5, %v1124_v5  ;;  %v1464_v5 = vsub.s32 1, %v3914_v27 }
 0x24d   : > { %3246 = vmatpush3.bf16.msra.mxu1 %v3243_v39 }
 0x24e   : > { %3248 = vmatprep.subr.bf16.mxu1 %v3247_v4  ;;  %v1465_v60 = vrot.slane %v3949_v1, %v1464_v5 }
 0x251   : > { %v1200_v41 = vpop.f32.mrb[14].mxu1  ;;  %3250 = vmatpush3.bf16.msra.mxu1 %v3247_v4 }
 0x252   : > { %v1204_v44 = vmul.f32 0.015625, %v1200_v41  ;;  %v3100_v45 = vpop.f32.mrb[15].mxu1  ;;  %3260 = vmatprep.subr.bf16.mxu1 %v4109_v12 }
 0x254   : > { %v1206_v49 = vsub.f32 %v1204_v44, %v1205_v42  ;;  %v1476_v42 = vsub.s32 2, %v3914_v27 }
 0x256   : > { %v1207_v51 = vmax.f32 %v1206_v49, 0.0  ;;  %v1477_v4 = vrot.slane %v3949_v1, %v1476_v42 }
 0x258   : > { %3109 = vmatmul.mubr.msk.f32.vlgmr.msra.gmra.mrb[12].mxu0 %vm1208_vm0, %v1207_v51 }
 0x259   : > { %3254 = vmatpush3.bf16.msra.mxu0 %v3251_v0 }
 0x25a   : > { %3256 = vmatprep.subr.bf16.mxu0 %v3255_v56 }
 0x25d   : > { %3258 = vmatpush3.bf16.msra.mxu0 %v3255_v56 }
 0x25e   : > { %3267 = vmatprep.subr.bf16.mxu0 %v3601_v22 }
 0x31f   : > { %v1278_v13 = vpop.f32.mrb[16].mxu1 }
 0x320   : > { %v3105_v11 = vpop.f32.mrb[17].mxu1  ;;  %v1363_v30 = vrot.slane %v1278_v13, %v4113_v17 }
 0x322   : > { %v1364_v7 = vcombine.high %v1363_v30, %v1363_v30  ;;  %v1371_v32 = vrot.slane %v1363_v30, %v4113_v17 }
 0x324   : > { %v1378_v33 = vrot.slane %v1364_v7, %v4113_v17  ;;  %v1379_v35 = vcombine.high %v1371_v32, %v1371_v32  ;;  %v1384_v2 = vrot.slane %v1371_v32, %v3940_v59  ;;  %v2862_v32 = vld [vmem:[%s4138_s18 + $0x1] ss:$0 sm:$0xff] }
 0x326   : > { %v1380_v36 = vcombine.high %v1378_v33, %v1378_v33  ;;  %v1388_v41 = vrot.slane %v1378_v33, %v3940_v59  ;;  %v1392_v49 = vrot.slane %v1379_v35, %v3940_v59  ;;  %v1401_v43 = vsub.f32 %v3986_v38, %v1384_v2 }
 0x327   : > { %v1402_v61 = vsub.f32 %v4001_v54, %v1384_v2 }
 0x328   : > { %v1396_v51 = vrot.slane %v1380_v36, %v3940_v59  ;;  %v1403_v47 = vsub.f32 %v4004_v55, %v1388_v41  ;;  %v1404_v0 = vsub.f32 %v4025_v21, %v1388_v41  ;;  %v1405_v56 = vsub.f32 %v4053_v40, %v1392_v49 }
 0x329   : > { %v1406_v9 = vsub.f32 %v4073_v8, %v1392_v49 }
 0x32a   : > { %v1407_v55 = vsub.f32 %v4064_v62, %v1396_v51  ;;  %v1408_v11 = vsub.f32 %v4059_v57, %v1396_v51 }
 0x32b   : > { %v1351_v20 = vpop.f32.mrb[12].mxu0 }
 0x32c   : > { %v1352_v31 = vadd.f32 1e-05, %v1351_v20  ;;  %v3110_v3 = vpop.f32.mrb[13].mxu0 }
 0x32e   : > { %3360 = vrsqrt.f32 %v1352_v31 }
 0x338   : > { %v3361_v34 = vpop.eup %3360 }
 0x339   : > { %v1416_v37 = vrot.slane %v3361_v34, %v4113_v17 }
 0x33b   : > { %v1417_v44 = vcombine.high %v1416_v37, %v1416_v37  ;;  %v1424_v45 = vrot.slane %v1416_v37, %v4113_v17  ;;  %v2863_v37 = vld [vmem:[%s4138_s18 + $0x2] ss:$0 sm:$0xff] }
 0x33d   : > { %v1431_v39 = vrot.slane %v1417_v44, %v4113_v17  ;;  %v1432_v58 = vcombine.high %v1424_v45, %v1424_v45  ;;  %v1437_v63 = vrot.slane %v1424_v45, %v3940_v59 }
 0x33f   : > { %v1433_v6 = vcombine.high %v1431_v39, %v1431_v39  ;;  %v1454_v38 = vmul.f32 %v1437_v63, %v1401_v43  ;;  %v1455_v54 = vmul.f32 %v1437_v63, %v1402_v61  ;;  %v1441_v46 = vrot.slane %v1431_v39, %v3940_v59  ;;  %v2864_v39 = vld [vmem:[%s4138_s18 + $0x3] ss:$0 sm:$0xff]  ;;  %s2717_s18 = sshll.u32 %s367_s17, 4  ;;  %s4413_s18 = int_to_ptr.vmem [resolvable:$true] %s2717_s18 }
 0x340   : > { %v1445_v21 = vrot.slane %v1432_v58, %v3940_v59  ;;  %s3524_s26 = scalar_lea.vmem %s4413_s18, 1024  ;;  %p3531_p9 = scmp.lt.s32.totalorder %s4413_s18, %s3529_s11 }
 0x341   : > { %v1466_v10 = vmul.f32 %v1465_v60, %v1454_v38  ;;  %v1467_v13 = vmul.f32 %v1465_v60, %v1455_v54  ;;  %v1456_v14 = vmul.f32 %v1441_v46, %v1403_v47  ;;  %v1457_v16 = vmul.f32 %v1441_v46, %v1404_v0  ;;  %p3525_p0 = scmp.ne.s32.totalorder %s4413_s18, %s3524_s26  ;;  %p3532_p12 = scmp.lt.s32.totalorder %s3530_s13, %s3524_s26 }
 0x342   : > { %v1458_v20 = vmul.f32 %v1445_v21, %v1405_v56  ;;  %v1459_v30 = vmul.f32 %v1445_v21, %v1406_v9  ;;  %v1449_v31 = vrot.slane %v1433_v6, %v3940_v59 }
 0x343   : > { %v1478_v40 = vadd.f32 %v1477_v4, %v1466_v10  ;;  %v1479_v3 = vadd.f32 %v1477_v4, %v1467_v13  ;;  %v1468_v8 = vmul.f32 %v1465_v60, %v1456_v14  ;;  %v1469_v7 = vmul.f32 %v1465_v60, %v1457_v16  ;;  %p3526_p3 = pnand %p3525_p0, %p4511_p2  ;;  %p3533_p1 = por %p3532_p12, %p3531_p9 }
 0x344   : > { %v1470_v62 = vmul.f32 %v1465_v60, %v1458_v20  ;;  %v1471_v33 = vmul.f32 %v1465_v60, %v1459_v30  ;;  %v1460_v34 = vmul.f32 %v1449_v31, %v1407_v55  ;;  %v1461_v35 = vmul.f32 %v1449_v31, %v1408_v11 }
 0x345   : > { %v1514_v36 = vadd.f32 %v2861_v18, %v1478_v40  ;;  %v4149_v2 = vadd.f32 %v2861_v18, %v1479_v3  ;;  %v1480_v57 = vadd.f32 %v1477_v4, %v1468_v8  ;;  %v1481_v5 = vadd.f32 %v1477_v4, %v1469_v7  ;;  %p3527_p7 = pneg %p3526_p3 }
 0x346   : > { %v1482_v41 = vadd.f32 %v1477_v4, %v1470_v62  ;;  %v1483_v42 = vadd.f32 %v1477_v4, %v1471_v33  ;;  %v1472_v44 = vmul.f32 %v1465_v60, %v1460_v34  ;;  %v1473_v45 = vmul.f32 %v1465_v60, %v1461_v35  ;;  %v1848_v33 = vld [vmem:[#allocation7 + $0x50] sm:$0xff]  ;;  %v1849_v34 = vld [vmem:[#allocation7 + $0x58] sm:$0xff] }
 0x347   : > { %v2865_v49 = vmul.f32 -1.442695, %v1514_v36  ;;  %v2866_v51 = vmul.f32 -1.442695, %v4149_v2  ;;  %v1516_v43 = vadd.f32 %v2862_v32, %v1480_v57  ;;  %v4153_v61 = vadd.f32 %v2862_v32, %v1481_v5  ;;  %p3534_p13 = pnand %p3533_p1, %p3527_p7 }
 0x348   : > { %v4156_v58 = vadd.f32 %v2863_v37, %v1482_v41  ;;  %v4158_v63 = vadd.f32 %v2863_v37, %v1483_v42  ;;  %v1484_v47 = vadd.f32 %v1477_v4, %v1472_v44  ;;  %v1485_v0 = vadd.f32 %v1477_v4, %v1473_v45 }
 0x349   : > { %3362 = vpow2.f32 %v2865_v49  ;;  %v2867_v6 = vmul.f32 -1.442695, %v1516_v43  ;;  %v2868_v38 = vmul.f32 -1.442695, %v4153_v61  ;;  %v3263_v44 = vpack.c.bf16 %v1849_v34, %v1848_v33 }
 0x34a   : > { %3364 = vpow2.f32 %v2866_v51  ;;  %v2869_v60 = vmul.f32 -1.442695, %v4156_v58  ;;  %v2870_v54 = vmul.f32 -1.442695, %v4158_v63  ;;  %v4163_v46 = vadd.f32 %v2864_v39, %v1484_v47 }
 0x34b   : > { %3366 = vpow2.f32 %v2867_v6  ;;  %v4165_v56 = vadd.f32 %v2864_v39, %v1485_v0 }
 0x34c   : > { %3368 = vpow2.f32 %v2868_v38  ;;  %v2871_v9 = vmul.f32 -1.442695, %v4163_v46 }
 0x34d   : > { %3370 = vpow2.f32 %v2869_v60  ;;  %v2872_v4 = vmul.f32 -1.442695, %v4165_v56 }
 0x34e   : > { %3372 = vpow2.f32 %v2870_v54 }
 0x34f   : > { %3374 = vpow2.f32 %v2871_v9 }
 0x350   : > { %3376 = vpow2.f32 %v2872_v4 }
 0x353   : > { %v3363_v55 = vpop.eup %3362 }
 0x354   : > { %v3365_v21 = vpop.eup %3364  ;;  %v1546_v10 = vadd.f32 1.0, %v3363_v55 }
 0x355   : > { %v3367_v13 = vpop.eup %3366  ;;  %v1547_v14 = vadd.f32 1.0, %v3365_v21 }
 0x356   : > { %v3369_v16 = vpop.eup %3368  ;;  %3378 = vrcp.f32 %v1546_v10  ;;  %v1548_v11 = vadd.f32 1.0, %v3367_v13 }
 0x357   : > { %v3371_v18 = vpop.eup %3370  ;;  %3380 = vrcp.f32 %v1547_v14  ;;  %v1549_v20 = vadd.f32 1.0, %v3369_v16 }
 0x358   : > { %v3373_v30 = vpop.eup %3372  ;;  %3382 = vrcp.f32 %v1548_v11  ;;  %v1550_v31 = vadd.f32 1.0, %v3371_v18 }
 0x359   : > { %v3375_v40 = vpop.eup %3374  ;;  %3384 = vrcp.f32 %v1549_v20  ;;  %v1551_v3 = vadd.f32 1.0, %v3373_v30 }
 0x35a   : > { %v3377_v8 = vpop.eup %3376  ;;  %3386 = vrcp.f32 %v1550_v31  ;;  %v1552_v7 = vadd.f32 1.0, %v3375_v40 }
 0x35b   : > { %3388 = vrcp.f32 %v1551_v3  ;;  %v1553_v32 = vadd.f32 1.0, %v3377_v8 }
 0x35c   : > { %3390 = vrcp.f32 %v1552_v7 }
 0x35d   : > { %3392 = vrcp.f32 %v1553_v32 }
 0x360   : > { %v3379_v62 = vpop.eup %3378 }
 0x361   : > { %v3381_v35 = vpop.eup %3380  ;;  %v1570_v57 = vmul.f32 %v3379_v62, %v1514_v36 }
 0x362   : > { %v3383_v5 = vpop.eup %3382  ;;  %v1571_v37 = vmul.f32 %v3381_v35, %v4149_v2 }
 0x363   : > { %v3385_v41 = vpop.eup %3384  ;;  %3119 = vmatprep.mubr.msk.f32.mxu1 %vm960_vm8, %v1570_v57  ;;  %3139 = vmatprep.mubr.msk.f32.mxu0 %vm960_vm8, %v1570_v57  ;;  %v1572_v42 = vmul.f32 %v3383_v5, %v1516_v43 }
 0x364   : > { %v3387_v45 = vpop.eup %3386  ;;  %3120 = vmatmul.mubr.msk.f32.vlgmr.msra.gmra.mrb[18].mxu1 %vm960_vm8, %v1571_v37  ;;  %3140 = vmatmul.mubr.msk.f32.vlgmr.msra.gmra.mrb[14].mxu0 %vm960_vm8, %v1571_v37  ;;  %v1573_v36 = vmul.f32 %v3385_v41, %v4153_v61 }
 0x365   : > { %3122 = vmatprep.mubr.msk.f32.mxu1 %vm960_vm8, %v1572_v42  ;;  %3142 = vmatprep.mubr.msk.f32.mxu0 %vm960_vm8, %v1572_v42  ;;  %v3389_v2 = vpop.eup %3388  ;;  %v1574_v49 = vmul.f32 %v3387_v45, %v4156_v58 }
 0x366   : > { %3262 = vmatpush3.bf16.msra.mxu1 %v4109_v12  ;;  %3269 = vmatpush3.bf16.msra.mxu0 %v3888_v19  ;;  %v3391_v51 = vpop.eup %3390  ;;  %v1575_v12 = vmul.f32 %v3389_v2, %v4158_v63 }
 0x367   : > { %3264 = vmatprep.subr.bf16.mxu1 %v3263_v44  ;;  %3270 = vmatprep.subr.bf16.mxu0 %v3601_v22  ;;  %v3393_v43 = vpop.eup %3392  ;;  %v1576_v61 = vmul.f32 %v3391_v51, %v4163_v46 }
 0x368   : > { %3123 = vmatmul.mubr.msk.f32.gmra.mrb[20].mxu1 %vm960_vm8, %v1573_v36  ;;  %3143 = vmatmul.mubr.msk.f32.gmra.mrb[16].mxu0 %vm960_vm8, %v1573_v36  ;;  %v1577_v39 = vmul.f32 %v3393_v43, %v4165_v56 }
 0x369   : > { %3125 = vmatprep.mubr.msk.f32.mxu1 %vm960_vm8, %v1574_v49  ;;  %3145 = vmatprep.mubr.msk.f32.mxu0 %vm960_vm8, %v1574_v49 }
 0x36a   : > { %3266 = vmatpush3.bf16.msra.mxu1 %v3263_v44  ;;  %3272 = vmatpush3.bf16.msra.mxu0 %v3900_v24 }
 0x36b   : > { %3273 = vmatprep.subr.bf16.mxu0 %v3601_v22  ;;  %3198 = vmatprep.subr.mxu1 %v3603_v23 }
 0x36c   : > { %3126 = vmatmul.mubr.msk.f32.gmra.mrb[22].mxu1 %vm960_vm8, %v1575_v12  ;;  %3146 = vmatmul.mubr.msk.f32.gmra.mrb[18].mxu0 %vm960_vm8, %v1575_v12 }
 0x36d   : > { %3128 = vmatprep.mubr.msk.f32.mxu1 %vm960_vm8, %v1576_v61  ;;  %3148 = vmatprep.mubr.msk.f32.mxu0 %vm960_vm8, %v1576_v61 }
 0x370   : > { %3129 = vmatmul.mubr.msk.f32.gmra.mrb[24].mxu1 %vm960_vm8, %v1577_v39  ;;  %3149 = vmatmul.mubr.msk.f32.gmra.mrb[20].mxu0 %vm960_vm8, %v1577_v39 }
 0x371   : > { %3159 = vmatprep.mubr.msk.f32.mxu1 %vm960_vm8, %v1570_v57  ;;  %3179 = vmatprep.mubr.msk.f32.mxu0 %vm3602_vm1, %v3603_v23 }
 0x374   : > { %3160 = vmatmul.mubr.msk.f32.vlgmr.msra.gmra.mrb[26].mxu1 %vm960_vm8, %v1571_v37 }
 0x375   : > { %3162 = vmatprep.mubr.msk.f32.mxu1 %vm960_vm8, %v1572_v42  ;;  %3199 = vmatpush3.msra.mxu1 %v3911_v25 }
 0x378   : > { %3163 = vmatmul.mubr.msk.f32.gmra.mrb[28].mxu1 %vm960_vm8, %v1573_v36 }
 0x379   : > { %3165 = vmatprep.mubr.msk.f32.mxu1 %vm960_vm8, %v1574_v49 }
 0x37c   : > { %3166 = vmatmul.mubr.msk.f32.gmra.mrb[30].mxu1 %vm960_vm8, %v1575_v12 }
 0x37d   : > { %3168 = vmatprep.mubr.msk.f32.mxu1 %vm960_vm8, %v1576_v61 }
 0x380   : > { %3169 = vmatmul.mubr.msk.f32.gmra.mrb[32].mxu1 %vm960_vm8, %v1577_v39 }
 0x381   : > { %3200 = vmatprep.mubr.msk.f32.mxu1 %vm3602_vm1, %v3603_v23 }
 0x437   : > { %v3121_v58 = vpop.f32.mrb[18].mxu1  ;;  %v3141_v63 = vpop.f32.mrb[14].mxu0 }
 0x438   : > { %v1717_v47 = vrot.slane %v3121_v58, 7  ;;  %v1677_v0 = vpop.f32.mrb[19].mxu1  ;;  %v1806_v6 = vpop.f32.mrb[15].mxu0 }
 0x439   : > { %v1716_v38 = vrot.slane %v1677_v0, 7 }
 0x43b   : > { %v1730_v25 = vsel %vm653_vm2, %v1716_v38, %v1717_v47  ;;  %v3124_v60 = vpop.f32.mrb[20].mxu1  ;;  %v3144_v54 = vpop.f32.mrb[16].mxu0 }
 0x43c   : > { %v1812_v46 = vadd.f32 %v3141_v63, %v1730_v25  ;;  %v1719_v56 = vrot.slane %v3124_v60, 7  ;;  %v1687_v9 = vpop.f32.mrb[21].mxu1  ;;  %v1816_v4 = vpop.f32.mrb[17].mxu0  ;;  %v4240_v63 = vrot.slane %v3949_v1, %v1989_v29 }
 0x43d   : > { %v1718_v55 = vrot.slane %v1687_v9, 7 }
 0x43f   : > { %v1728_v21 = vsel %vm653_vm2, %v1718_v55, %v1719_v56  ;;  %v1729_v10 = vsel %vm653_vm2, %v1717_v47, %v1718_v55  ;;  %v3127_v13 = vpop.f32.mrb[22].mxu1  ;;  %v3147_v14 = vpop.f32.mrb[18].mxu0 }
 0x440   : > { %v1822_v16 = vadd.f32 %v3144_v54, %v1728_v21  ;;  %v1734_v11 = vsel %vm3931_vm4, 0.0, %v1729_v10  ;;  %v1721_v18 = vrot.slane %v3127_v13, 7  ;;  %v1697_v20 = vpop.f32.mrb[23].mxu1  ;;  %v1826_v30 = vpop.f32.mrb[19].mxu0 }
 0x441   : > { %v1817_v31 = vadd.f32 %v1816_v4, %v1734_v11  ;;  %v1720_v40 = vrot.slane %v1697_v20, 7 }
 0x443   : > { %v1726_v3 = vsel %vm653_vm2, %v1720_v40, %v1721_v18  ;;  %v1727_v8 = vsel %vm653_vm2, %v1719_v56, %v1720_v40  ;;  %v3130_v7 = vpop.f32.mrb[24].mxu1  ;;  %v3150_v32 = vpop.f32.mrb[20].mxu0 }
 0x444   : > { %v4222_v62 = vadd.f32 %v3147_v14, %v1726_v3  ;;  %v1736_v33 = vsel %vm3975_vm7, 0.0, %v1727_v8  ;;  %v1723_v53 = vrot.slane %v3130_v7, 7  ;;  %v1707_v34 = vpop.f32.mrb[25].mxu1  ;;  %v1836_v35 = vpop.f32.mrb[21].mxu0 }
 0x445   : > { %v1827_v57 = vadd.f32 %v1826_v30, %v1736_v33  ;;  %v1722_v5 = vrot.slane %v1707_v34, 7 }
 0x446   : > { %v1731_v37 = vsel %vm653_vm2, %v1723_v53, %v1716_v38 }
 0x447   : > { %v1732_v41 = vsel %vm3924_vm3, 0.0, %v1731_v37  ;;  %v1724_v42 = vsel %vm653_vm2, %v1722_v5, %v1723_v53  ;;  %v1725_v44 = vsel %vm653_vm2, %v1721_v18, %v1722_v5  ;;  %v3161_v45 = vpop.f32.mrb[26].mxu1 }
 0x448   : > { %v1807_v36 = vadd.f32 %v1806_v6, %v1732_v41  ;;  %v1842_v2 = vadd.f32 %v3150_v32, %v1724_v42  ;;  %v1738_v49 = vsel %vm3996_vm10, 0.0, %v1725_v44  ;;  %v1956_v51 = vrot.slane %v3161_v45, 1  ;;  %v1916_v12 = vpop.f32.mrb[27].mxu1 }
 0x449   : > { %v1837_v43 = vadd.f32 %v1836_v35, %v1738_v49  ;;  %v1955_v61 = vrot.slane %v1916_v12, 1 }
 0x44b   : > { %v1969_v48 = vsel %vm907_vm5, %v1955_v61, %v1956_v51  ;;  %v3164_v39 = vpop.f32.mrb[28].mxu1 }
 0x44c   : > { %v1979_v58 = vadd.f32 %v1969_v48, %v1807_v36  ;;  %v1958_v47 = vrot.slane %v3164_v39, 1  ;;  %v1926_v0 = vpop.f32.mrb[29].mxu1 }
 0x44d   : > { %v1957_v38 = vrot.slane %v1926_v0, 1 }
 0x44e   : > { %v4247_v60 = vadd.f32 %v4240_v63, %v1979_v58 }
 0x44f   : > { %v1967_v6 = vsel %vm907_vm5, %v1957_v38, %v1958_v47  ;;  %v1968_v52 = vsel %vm907_vm5, %v1956_v51, %v1957_v38  ;;  %v3167_v25 = vpop.f32.mrb[30].mxu1 }
 0x450   : > { %v1972_v54 = vsel %vm3971_vm6, 0.0, %v1968_v52  ;;  %v1981_v56 = vadd.f32 %v1967_v6, %v1817_v31  ;;  %v1936_v9 = vpop.f32.mrb[31].mxu1  ;;  %v1960_v4 = vrot.slane %v3167_v25, 1  ;;  %v1999_v26 = vsel %vm960_vm8, %v4247_v60, 0.0 }
 0x451   : > { %v1980_v1 = vadd.f32 %v1972_v54, %v1812_v46  ;;  %v1959_v55 = vrot.slane %v1936_v9, 1  ;;  %v2035_v8 = vmul.f32 %v4247_v60, %v4247_v60 }
 0x452   : > { %v4252_v21 = vadd.f32 %v4240_v63, %v1981_v56 }
 0x453   : > { %v4255_v10 = vadd.f32 %v4240_v63, %v1980_v1  ;;  %v1965_v13 = vsel %vm907_vm5, %v1959_v55, %v1960_v4  ;;  %v1966_v14 = vsel %vm907_vm5, %v1958_v47, %v1959_v55  ;;  %v3170_v11 = vpop.f32.mrb[32].mxu1  ;;  %v2043_v42 = vsel %vm960_vm8, %v2035_v8, 0.0 }
 0x454   : > { %v1974_v46 = vsel %vm3992_vm9, 0.0, %v1966_v14  ;;  %v1983_v18 = vadd.f32 %v1965_v13, %v1827_v57  ;;  %v1946_v20 = vpop.f32.mrb[33].mxu1  ;;  %v1962_v3 = vrot.slane %v3170_v11, 1  ;;  %v2037_v32 = vmul.f32 %v4252_v21, %v4252_v21 }
 0x455   : > { %v2000_v30 = vsel %vm960_vm8, %v4255_v10, 0.0  ;;  %v2036_v31 = vmul.f32 %v4255_v10, %v4255_v10  ;;  %v1982_v40 = vadd.f32 %v1974_v46, %v1822_v16  ;;  %v1961_v33 = vrot.slane %v1946_v20, 1 }
 0x456   : > { %v2001_v7 = vadd.f32 %v2000_v30, %v1999_v26  ;;  %v1970_v53 = vsel %vm907_vm5, %v1962_v3, %v1955_v61  ;;  %v2008_v35 = vsel %vm960_vm8, %v4252_v21, 0.0  ;;  %v2052_v44 = vsel %vm960_vm8, %v2037_v32, 0.0 }
 0x457   : > { %v4274_v50 = vadd.f32 %v4240_v63, %v1982_v40  ;;  %v2044_v16 = vsel %vm960_vm8, %v2036_v31, 0.0  ;;  %v1978_v37 = vsel %vm4027_vm11, 0.0, %v1970_v53  ;;  %v1963_v41 = vsel %vm907_vm5, %v1961_v33, %v1962_v3 }
 0x458   : > { %v2002_v34 = vrot.slane %v2001_v7, 4  ;;  %v4292_v45 = vadd.f32 %v4240_v63, %v1983_v18  ;;  %v1986_v49 = vadd.f32 %v1978_v37, %v1842_v2  ;;  %v1964_v51 = vsel %vm907_vm5, %v1960_v4, %v1961_v33 }
 0x459   : > { %v2009_v57 = vsel %vm960_vm8, %v4274_v50, 0.0  ;;  %v2038_v5 = vmul.f32 %v4274_v50, %v4274_v50  ;;  %v1985_v12 = vadd.f32 %v1963_v41, %v1837_v43  ;;  %v2045_v28 = vadd.f32 %v2044_v16, %v2043_v42 }
 0x45a   : > { %v2010_v29 = vadd.f32 %v2009_v57, %v2008_v35  ;;  %v2003_v39 = vadd.f32 %v2002_v34, %v2001_v7  ;;  %v4298_v58 = vadd.f32 %v4240_v63, %v1986_v49  ;;  %v1976_v47 = vsel %vm4037_vm12, 0.0, %v1964_v51 }
 0x45b   : > { %v2053_v36 = vsel %vm960_vm8, %v2038_v5, 0.0  ;;  %v4303_v0 = vadd.f32 %v4240_v63, %v1985_v12  ;;  %v2039_v2 = vmul.f32 %v4292_v45, %v4292_v45  ;;  %v1984_v43 = vadd.f32 %v1976_v47, %v4222_v62 }
 0x45c   : > { %v2011_v61 = vrot.slane %v2010_v29, 4  ;;  %v2054_v48 = vadd.f32 %v2053_v36, %v2052_v44  ;;  %v2027_v52 = vsel %vm960_vm8, %v4298_v58, 0.0  ;;  %v2042_v25 = vmul.f32 %v4298_v58, %v4298_v58 }
 0x45d   : > { %v2026_v15 = vsel %vm960_vm8, %v4303_v0, 0.0  ;;  %v2041_v54 = vmul.f32 %v4303_v0, %v4303_v0  ;;  %v2046_v56 = vrot.slane %v2045_v28, 4  ;;  %v4317_v1 = vadd.f32 %v4240_v63, %v1984_v43 }
 0x45e   : > { %v2012_v38 = vadd.f32 %v2011_v61, %v2010_v29  ;;  %v2055_v6 = vrot.slane %v2054_v48, 4  ;;  %v2028_v4 = vadd.f32 %v2027_v52, %v2026_v15  ;;  %v2004_v55 = vrot.slane %v2003_v39, 2 }
 0x45f   : > { %v2017_v62 = vsel %vm960_vm8, %v4292_v45, 0.0  ;;  %v2071_v13 = vsel %vm960_vm8, %v2042_v25, 0.0  ;;  %v2070_v14 = vsel %vm960_vm8, %v2041_v54, 0.0  ;;  %v2018_v26 = vsel %vm960_vm8, %v4317_v1, 0.0 }
 0x460   : > { %v2013_v9 = vrot.slane %v2012_v38, 2  ;;  %v2056_v11 = vadd.f32 %v2055_v6, %v2054_v48  ;;  %v2029_v46 = vrot.slane %v2028_v4, 4  ;;  %v2040_v18 = vmul.f32 %v4317_v1, %v4317_v1 }
 0x461   : > { %v2061_v63 = vsel %vm960_vm8, %v2039_v2, 0.0  ;;  %v2019_v20 = vadd.f32 %v2018_v26, %v2017_v62  ;;  %v2072_v30 = vadd.f32 %v2071_v13, %v2070_v14  ;;  %v2047_v31 = vadd.f32 %v2046_v56, %v2045_v28 }
 0x462   : > { %v2014_v40 = vadd.f32 %v2013_v9, %v2012_v38  ;;  %v2030_v3 = vadd.f32 %v2029_v46, %v2028_v4  ;;  %v2062_v8 = vsel %vm960_vm8, %v2040_v18, 0.0  ;;  %v2005_v53 = vadd.f32 %v2004_v55, %v2003_v39 }
 0x463   : > { %v2020_v7 = vrot.slane %v2019_v20, 4  ;;  %v2063_v32 = vadd.f32 %v2062_v8, %v2061_v63  ;;  %v2073_v33 = vrot.slane %v2072_v30, 4  ;;  %v2057_v35 = vrot.slane %v2056_v11, 2  ;;  %v3431_v8 = vld [vmem:[%s3840_s20 + $0x10] sm:$0xff] }
 0x464   : > { %v2031_v34 = vrot.slane %v2030_v3, 2  ;;  %v2015_v5 = vrot.slane %v2014_v40, 1  ;;  %v2048_v41 = vrot.slane %v2047_v31, 2  ;;  %v2006_v36 = vrot.slane %v2005_v53, 1 }
 0x465   : > { %v2021_v16 = vadd.f32 %v2020_v7, %v2019_v20  ;;  %v2064_v57 = vrot.slane %v2063_v32, 4  ;;  %v2074_v42 = vadd.f32 %v2073_v33, %v2072_v30  ;;  %v2058_v49 = vadd.f32 %v2057_v35, %v2056_v11  ;;  %v3433_v35 = vld [vmem:[%s3840_s20 + $0x20] sm:$0xff] }
 0x466   : > { %v2032_v37 = vadd.f32 %v2031_v34, %v2030_v3  ;;  %v2016_v28 = vadd.f32 %v2015_v5, %v2014_v40  ;;  %v2049_v48 = vadd.f32 %v2048_v41, %v2047_v31  ;;  %v2007_v2 = vadd.f32 %v2006_v36, %v2005_v53  ;;  %v3429_v40 = vld [vmem:[%s3840_s20] sm:$0xff]  ;;  %v3432_v34 = vld [vmem:[%s3840_s20 + $0x18] sm:$0xff]  ;;  %v3435_v5 = vld [vmem:[%s3840_s20 + $0x30] sm:$0xff] }
 0x467   : > { %v2022_v44 = vrot.slane %v2021_v16, 2  ;;  %v2065_v29 = vadd.f32 %v2064_v57, %v2063_v32  ;;  %v2075_v47 = vrot.slane %v2074_v42, 2  ;;  %v2059_v6 = vrot.slane %v2058_v49, 1  ;;  %v3434_v57 = vld [vmem:[%s3840_s20 + $0x28] sm:$0xff] }
 0x468   : > { %v2033_v61 = vrot.slane %v2032_v37, 1  ;;  %v2083_v15 = vsel %vm1045_vm13, %v2016_v28, %v2007_v2  ;;  %v2050_v54 = vrot.slane %v2049_v48, 1 }
 0x469   : > { %v2023_v51 = vadd.f32 %v2022_v44, %v2021_v16  ;;  %v2066_v12 = vrot.slane %v2065_v29, 2  ;;  %v2076_v56 = vadd.f32 %v2075_v47, %v2074_v42  ;;  %v2060_v55 = vadd.f32 %v2059_v6, %v2058_v49 }
 0x46a   : > { %v2034_v25 = vadd.f32 %v2033_v61, %v2032_v37  ;;  %v2051_v13 = vadd.f32 %v2050_v54, %v2049_v48  ;;  %v3436_v37 = vld [vmem:[%s3840_s20 + $0x38] sm:$0xff]  ;;  %v2497_v54 = vsub.s32 4, %v3914_v27 }
 0x46b   : > { %v2024_v38 = vrot.slane %v2023_v51, 1  ;;  %v2067_v39 = vadd.f32 %v2066_v12, %v2065_v29  ;;  %v2077_v14 = vrot.slane %v2076_v56, 1 }
 0x46c   : > { %v2163_v11 = vsel %vm1045_vm13, %v2060_v55, %v2051_v13 }
 0x46d   : > { %v2025_v43 = vadd.f32 %v2024_v38, %v2023_v51  ;;  %v2068_v52 = vrot.slane %v2067_v39, 1  ;;  %v2078_v46 = vadd.f32 %v2077_v14, %v2076_v56  ;;  %v2509_v56 = vsub.s32 5, %v3914_v27 }
 0x46f   : > { %v2084_v9 = vsel %vm1047_vm14, %v2025_v43, %v2083_v15  ;;  %v2069_v62 = vadd.f32 %v2068_v52, %v2067_v39  ;;  %v2523_v52 = vsub.s32 6, %v3914_v27 }
 0x470   : > { %v2085_v4 = vsel %vm1049_vm15, %v2034_v25, %v2084_v9  ;;  %v3437_v9 = vld [vmem:[%s4465_s5] sm:$0xff] }
 0x471   : > { %3180 = vmatmul.mubr.msk.f32.vlgmr.msra.gmra.mrb[22].mxu0 %vm960_vm8, %v2085_v4  ;;  %v2164_v26 = vsel %vm1047_vm14, %v2069_v62, %v2163_v11  ;;  %v2524_v4 = vrot.slane %v3437_v9, %v2523_v52 }
 0x472   : > { %3275 = vmatpush3.bf16.msra.mxu0 %v3888_v19  ;;  %3190 = vmatprep.mubr.msk.f32.mxu0 %vm3602_vm1, %v3603_v23  ;;  %v2165_v18 = vsel %vm1049_vm15, %v2078_v46, %v2164_v26  ;;  %v3428_v19 = vld [vmem:[%s4467_s7] sm:$0xff]  ;;  %v2498_v46 = vrot.slane %v3437_v9, %v2497_v54 }
 0x473   : > { %3276 = vmatprep.subr.bf16.mxu0 %v3601_v22  ;;  %v2519_v22 = vld [vmem:[%s4464_s4] sm:$0xff] }
 0x476   : > { %3278 = vmatpush3.bf16.msra.mxu0 %v3900_v24  ;;  %v2520_v24 = vld [vmem:[%s4464_s4 + $0x8] sm:$0xff] }
 0x477   : > { %3193 = vmatprep.subr.mxu0 %v3603_v23  ;;  %v3279_v63 = vpack.c.bf16 %v2520_v24, %v2519_v22 }
 0x479   : > { %3191 = vmatmul.mubr.msk.f32.vlgmr.msra.gmra.mrb[24].mxu0 %vm960_vm8, %v2165_v18  ;;  %v2510_v18 = vrot.slane %v3437_v9, %v2509_v56 }
 0x47a   : > { %3194 = vmatpush3.msra.mxu0 %v3428_v19  ;;  %3195 = vmatprep.mubr.msk.f32.mxu0 %vm3602_vm1, %v3603_v23  ;;  %vm4503_vm1 = vcmask 130048   ;;  %v3430_v23 = vld [vmem:[%s3840_s20 + $0x8] sm:$0xff] }
 0x47b   : > { %3280 = vmatprep.subr.bf16.mxu0 %v3279_v63  ;;  %vm4504_vm2 = vmmov %vm4503_vm1 }
 0x47c   : > { %vm4505_vm3 = vmmov %vm4503_vm1 }
 0x47d   : > { %vm4506_vm4 = vmmov %vm4503_vm1 }
 0x47e   : > { %vm4507_vm5 = vmmov %vm4503_vm1 }
 0x47f   : > { %vm4508_vm6 = vmmov %vm4503_vm1 }
 0x480   : > { %vm4509_vm7 = vmmov %vm4503_vm1 }
 0x481   : > { %vm4510_vm9 = vmmov %vm4503_vm1 }
 0x544   : > { %v2154_v20 = vpop.f32.mrb[22].mxu0 }
 0x545   : > { %v2158_v30 = vmul.f32 0.015625, %v2154_v20  ;;  %v3181_v31 = vpop.f32.mrb[23].mxu0 }
 0x547   : > { %3196 = vmatmul.mubr.msk.f32.vlgmr.msra.gmra.mrb[26].mxu0 %vm1208_vm0, %v2158_v30  ;;  %v2239_v7 = vmul.f32 %v2158_v30, %v2158_v30 }
 0x548   : > { %3282 = vmatpush3.bf16.msra.mxu0 %v3279_v63  ;;  %3207 = vmatprep.mubr.msk.f32.mxu0 %vm4503_vm1, %v3429_v40 }
 0x54b   : > { %3208 = vmatmul.mubr.msk.f32.vlgmr.msra.gmra.mrb[28].mxu0 %vm4504_vm2, %v3430_v23 }
 0x54c   : > { %v2234_v3 = vpop.f32.mrb[24].mxu0  ;;  %3210 = vmatprep.mubr.msk.f32.mxu0 %vm4505_vm3, %v3431_v8 }
 0x54d   : > { %v2238_v32 = vmul.f32 0.015625, %v2234_v3  ;;  %v3192_v33 = vpop.f32.mrb[25].mxu0 }
 0x54f   : > { %v2240_v53 = vsub.f32 %v2238_v32, %v2239_v7  ;;  %3211 = vmatmul.mubr.msk.f32.gmra.mrb[30].mxu0 %vm4506_vm4, %v3432_v34 }
 0x550   : > { %3213 = vmatprep.mubr.msk.f32.mxu0 %vm4507_vm5, %v3433_v35 }
 0x551   : > { %v2241_v16 = vmax.f32 %v2240_v53, 0.0 }
 0x553   : > { %3201 = vmatmul.mubr.msk.f32.vlgmr.msra.gmra.mrb[34].mxu1 %vm1208_vm0, %v2241_v16  ;;  %3214 = vmatmul.mubr.msk.f32.gmra.mrb[32].mxu0 %vm4508_vm6, %v3434_v57 }
 0x554   : > { %3216 = vmatprep.mubr.msk.f32.mxu0 %vm4509_vm7, %v3435_v5 }
 0x557   : > { %3217 = vmatmul.mubr.msk.f32.gmra.mrb[34].mxu0 %vm4510_vm9, %v3436_v37 }
 0x61a   : > { %v2311_v41 = vpop.f32.mrb[26].mxu0 }
 0x61b   : > { %v3197_v42 = vpop.f32.mrb[27].mxu0  ;;  %v2396_v51 = vrot.slane %v2311_v41, %v4113_v17 }
 0x61d   : > { %v2397_v38 = vcombine.high %v2396_v51, %v2396_v51  ;;  %v2404_v2 = vrot.slane %v2396_v51, %v4113_v17 }
 0x61e   : > { %v3209_v44 = vpop.f32.mrb[28].mxu0 }
 0x61f   : > { %v2591_v29 = vpop.f32.mrb[29].mxu0  ;;  %v2411_v43 = vrot.slane %v2397_v38, %v4113_v17  ;;  %v2412_v25 = vcombine.high %v2404_v2, %v2404_v2  ;;  %v2417_v55 = vrot.slane %v2404_v2, %v3940_v59  ;;  %v2597_v19 = vadd.f32 %v3209_v44, %v2524_v4 }
 0x620   : > { %v2592_v63 = vadd.f32 %v2591_v29, %v2524_v4 }
 0x621   : > { %v2413_v15 = vcombine.high %v2411_v43, %v2411_v43  ;;  %v2421_v13 = vrot.slane %v2411_v43, %v3940_v59  ;;  %v2425_v14 = vrot.slane %v2412_v25, %v3940_v59  ;;  %v2434_v27 = vsub.f32 %v4247_v60, %v2417_v55 }
 0x622   : > { %v3212_v36 = vpop.f32.mrb[30].mxu0  ;;  %v2435_v20 = vsub.f32 %v4255_v10, %v2417_v55 }
 0x623   : > { %v2601_v49 = vpop.f32.mrb[31].mxu0  ;;  %v2429_v26 = vrot.slane %v2413_v15, %v3940_v59  ;;  %v2436_v30 = vsub.f32 %v4252_v21, %v2421_v13  ;;  %v2437_v31 = vsub.f32 %v4274_v50, %v2421_v13  ;;  %v2438_v40 = vsub.f32 %v4292_v45, %v2425_v14 }
 0x624   : > { %v2439_v23 = vsub.f32 %v4317_v1, %v2425_v14  ;;  %v2607_v60 = vadd.f32 %v3212_v36, %v2524_v4  ;;  %v2602_v32 = vadd.f32 %v2601_v49, %v2524_v4 }
 0x625   : > { %v2441_v33 = vsub.f32 %v4298_v58, %v2429_v26  ;;  %v2440_v53 = vsub.f32 %v4303_v0, %v2429_v26 }
 0x626   : > { %v2384_v12 = vpop.f32.mrb[34].mxu1  ;;  %v3215_v28 = vpop.f32.mrb[32].mxu0 }
 0x627   : > { %v2385_v61 = vadd.f32 1e-05, %v2384_v12  ;;  %v3202_v48 = vpop.f32.mrb[35].mxu1  ;;  %v2611_v47 = vpop.f32.mrb[33].mxu0  ;;  %v2617_v45 = vadd.f32 %v3215_v28, %v2524_v4 }
 0x628   : > { %v2612_v35 = vadd.f32 %v2611_v47, %v2524_v4 }
 0x629   : > { %3394 = vrsqrt.f32 %v2385_v61 }
 0x62a   : > { %v3218_v39 = vpop.f32.mrb[34].mxu0 }
 0x62b   : > { %v2621_v6 = vpop.f32.mrb[35].mxu0  ;;  %v2627_v16 = vadd.f32 %v3218_v39, %v2524_v4 }
 0x62c   : > { %v2622_v44 = vadd.f32 %v2621_v6, %v2524_v4 }
 0x633   : > { %v3395_v62 = vpop.eup %3394 }
 0x634   : > { %v2449_v11 = vrot.slane %v3395_v62, %v4113_v17 }
 0x636   : > { %v2450_v22 = vcombine.high %v2449_v11, %v2449_v11  ;;  %v2457_v24 = vrot.slane %v2449_v11, %v4113_v17 }
 0x638   : > { %v2470_v3 = vrot.slane %v2457_v24, %v3940_v59  ;;  %v2464_v8 = vrot.slane %v2450_v22, %v4113_v17  ;;  %v2465_v7 = vcombine.high %v2457_v24, %v2457_v24 }
 0x63a   : > { %v2488_v10 = vmul.f32 %v2470_v3, %v2435_v20  ;;  %v2487_v34 = vmul.f32 %v2470_v3, %v2434_v27  ;;  %v2474_v21 = vrot.slane %v2464_v8, %v3940_v59  ;;  %v2478_v50 = vrot.slane %v2465_v7, %v3940_v59 }
 0x63b   : > { %v2466_v1 = vcombine.high %v2464_v8, %v2464_v8 }
 0x63c   : > { %v2500_v57 = vmul.f32 %v2498_v46, %v2488_v10  ;;  %v2499_v5 = vmul.f32 %v2498_v46, %v2487_v34  ;;  %v2490_v17 = vmul.f32 %v2474_v21, %v2437_v31  ;;  %v2489_v37 = vmul.f32 %v2474_v21, %v2436_v30 }
 0x63d   : > { %v2492_v41 = vmul.f32 %v2478_v50, %v2439_v23  ;;  %v2491_v42 = vmul.f32 %v2478_v50, %v2438_v40  ;;  %v2482_v58 = vrot.slane %v2466_v1, %v3940_v59 }
 0x63e   : > { %v2512_v0 = vadd.f32 %v2510_v18, %v2500_v57  ;;  %v2511_v29 = vadd.f32 %v2510_v18, %v2499_v5  ;;  %v2502_v36 = vmul.f32 %v2498_v46, %v2490_v17  ;;  %v2501_v49 = vmul.f32 %v2498_v46, %v2489_v37 }
 0x63f   : > { %v2504_v51 = vmul.f32 %v2498_v46, %v2492_v41  ;;  %v2503_v12 = vmul.f32 %v2498_v46, %v2491_v42  ;;  %v2494_v61 = vmul.f32 %v2482_v58, %v2441_v33  ;;  %v2493_v28 = vmul.f32 %v2482_v58, %v2440_v53 }
 0x640   : > { %v2631_v48 = vadd.f32 %v2597_v19, %v2512_v0  ;;  %v2630_v47 = vadd.f32 %v2592_v63, %v2511_v29  ;;  %v2514_v38 = vadd.f32 %v2510_v18, %v2502_v36  ;;  %v2513_v39 = vadd.f32 %v2510_v18, %v2501_v49 }
 0x641   : > { %v2516_v2 = vadd.f32 %v2510_v18, %v2504_v51  ;;  %v2515_v43 = vadd.f32 %v2510_v18, %v2503_v12  ;;  %v2506_v52 = vmul.f32 %v2498_v46, %v2494_v61  ;;  %v2505_v25 = vmul.f32 %v2498_v46, %v2493_v28 }
 0x642   : > { %v2910_v15 = vmul.f32 -1.442695, %v2631_v48  ;;  %v2909_v54 = vmul.f32 -1.442695, %v2630_v47  ;;  %v2633_v59 = vadd.f32 %v2607_v60, %v2514_v38  ;;  %v2632_v6 = vadd.f32 %v2602_v32, %v2513_v39 }
 0x643   : > { %v2635_v56 = vadd.f32 %v2617_v45, %v2516_v2  ;;  %v2634_v9 = vadd.f32 %v2612_v35, %v2515_v43  ;;  %v2518_v4 = vadd.f32 %v2510_v18, %v2506_v52  ;;  %v2517_v55 = vadd.f32 %v2510_v18, %v2505_v25 }
 0x644   : > { %3396 = vpow2.f32 %v2910_v15  ;;  %v2912_v62 = vmul.f32 -1.442695, %v2633_v59  ;;  %v2911_v13 = vmul.f32 -1.442695, %v2632_v6 }
 0x645   : > { %3398 = vpow2.f32 %v2909_v54  ;;  %v2914_v14 = vmul.f32 -1.442695, %v2635_v56  ;;  %v2913_v11 = vmul.f32 -1.442695, %v2634_v9  ;;  %v2637_v26 = vadd.f32 %v2627_v16, %v2518_v4 }
 0x646   : > { %3400 = vpow2.f32 %v2912_v62  ;;  %v2636_v19 = vadd.f32 %v2622_v44, %v2517_v55 }
 0x647   : > { %3402 = vpow2.f32 %v2911_v13  ;;  %v2916_v27 = vmul.f32 -1.442695, %v2637_v26 }
 0x648   : > { %3404 = vpow2.f32 %v2914_v14  ;;  %v2915_v46 = vmul.f32 -1.442695, %v2636_v19 }
 0x649   : > { %3406 = vpow2.f32 %v2913_v11 }
 0x64a   : > { %3408 = vpow2.f32 %v2916_v27 }
 0x64b   : > { %3410 = vpow2.f32 %v2915_v46 }
 0x64e   : > { %v3397_v22 = vpop.eup %3396 }
 0x64f   : > { %v3399_v24 = vpop.eup %3398  ;;  %v2663_v63 = vadd.f32 1.0, %v3397_v22 }
 0x650   : > { %v3401_v18 = vpop.eup %3400  ;;  %v2662_v20 = vadd.f32 1.0, %v3399_v24 }
 0x651   : > { %v3403_v30 = vpop.eup %3402  ;;  %3412 = vrcp.f32 %v2663_v63  ;;  %v2665_v31 = vadd.f32 1.0, %v3401_v18 }
 0x652   : > { %v3405_v40 = vpop.eup %3404  ;;  %3414 = vrcp.f32 %v2662_v20  ;;  %v2664_v23 = vadd.f32 1.0, %v3403_v30 }
 0x653   : > { %v3407_v3 = vpop.eup %3406  ;;  %3416 = vrcp.f32 %v2665_v31  ;;  %v2667_v8 = vadd.f32 1.0, %v3405_v40 }
 0x654   : > { %v3409_v7 = vpop.eup %3408  ;;  %3418 = vrcp.f32 %v2664_v23  ;;  %v2666_v60 = vadd.f32 1.0, %v3407_v3 }
 0x655   : > { %v3411_v32 = vpop.eup %3410  ;;  %3420 = vrcp.f32 %v2667_v8  ;;  %v2669_v33 = vadd.f32 1.0, %v3409_v7 }
 0x656   : > { %3422 = vrcp.f32 %v2666_v60  ;;  %v2668_v53 = vadd.f32 1.0, %v3411_v32 }
 0x657   : > { %3424 = vrcp.f32 %v2669_v33 }
 0x658   : > { %3426 = vrcp.f32 %v2668_v53 }
 0x65b   : > { %v3413_v10 = vpop.eup %3412 }
 0x65c   : > { %v3415_v34 = vpop.eup %3414  ;;  %v2687_v21 = vmul.f32 %v3413_v10, %v2631_v48 }
 0x65d   : > { %v3417_v50 = vpop.eup %3416  ;;  %v2686_v45 = vmul.f32 %v3415_v34, %v2630_v47 }
 0x65e   : > { %v3419_v35 = vpop.eup %3418  ;;  %2695 = vst.msk [vmem:[%s367_s17 + $0x8] sm:$0xff] %vm960_vm8, %v2687_v21  ;;  %v2689_v1 = vmul.f32 %v3417_v50, %v2633_v59 }
 0x65f   : > { %v3421_v16 = vpop.eup %3420  ;;  %2694 = vst.msk [vmem:[%s367_s17] sm:$0xff] %vm960_vm8, %v2686_v45  ;;  %v2688_v57 = vmul.f32 %v3419_v35, %v2632_v6 }
 0x660   : > { %v3423_v5 = vpop.eup %3422  ;;  %2697 = vst.msk [vmem:[%s367_s17 + $0x18] sm:$0xff] %vm960_vm8, %v2689_v1  ;;  %v2691_v17 = vmul.f32 %v3421_v16, %v2635_v56 }
 0x661   : > { %v3425_v37 = vpop.eup %3424  ;;  %2696 = vst.msk [vmem:[%s367_s17 + $0x10] sm:$0xff] %vm960_vm8, %v2688_v57  ;;  %v2690_v41 = vmul.f32 %v3423_v5, %v2634_v9 }
 0x662   : > { %v3427_v42 = vpop.eup %3426  ;;  %2699 = vst.msk [vmem:[%s367_s17 + $0x28] sm:$0xff] %vm960_vm8, %v2691_v17  ;;  %v2693_v58 = vmul.f32 %v3425_v37, %v2637_v26 }
 0x663   : > { %2698 = vst.msk [vmem:[%s367_s17 + $0x20] sm:$0xff] %vm960_vm8, %v2690_v41  ;;  %v2692_v44 = vmul.f32 %v3427_v42, %v2636_v19 }
 0x664   : > { %2701 = vst.msk [vmem:[%s367_s17 + $0x38] sm:$0xff] %vm960_vm8, %v2693_v58 }
 0x665   : > { %2700 = vst.msk [vmem:[%s367_s17 + $0x30] sm:$0xff] %vm960_vm8, %v2692_v44 }
 0x666   : > { %3537 = shalt.err (!%p3534_p13)
}
 0x667   : > { %s3538_s20 = scalar_lea.hbm %s4411_s14, 1024  ;;  %s3542_s21 = scalar_lea.hbm %s4468_s8, 2048 }
 0x668   : > { %p3539_p6 = scmp.ne.s32.totalorder %s4411_s14, %s3538_s20  ;;  %p3543_p5 = scmp.lt.u32.totalorder %s4411_s14, %s4468_s8 }
 0x669   : > { %p3544_p8 = scmp.lt.u32.totalorder %s3542_s21, %s3538_s20  ;;  %p3546_p0 = scmp.lt.u32.totalorder %s3538_s20, %s4411_s14 }
 0x66a   : > { %p3540_p10 = pnand %p3539_p6, %p4511_p2 }
 0x66b   : > { %p3545_p11 = por %p3544_p8, %p3543_p5 }
 0x66c   : > { %p3541_p4 = pneg %p3540_p10 }
 0x66d   : > { %p3547_p3 = por %p3546_p0, %p3545_p11 }
 0x66f   : > { %p3548_p7 = pnand %p3547_p3, %p3541_p4 }
 0x671   : > { %3551 = shalt.err (!%p3548_p7)
}
 0x672   : > { %s3606_s26 = smov 128   ;;  %s3607_s25 = smov 8  }
 0x673   : > { %3295 = dma.vmem_to_hbm [thread:$0]  (%p4511_p2), %s4413_s18, 1024, %s4411_s14, %s2703_s9, %s3606_s26, %s3606_s26, %s3607_s25  }
 0x674 PF: > { %s2732_s11 = sand.u32 1, %s3582_s27   ;;  %p4512_p9 = scmp.ne.s32.totalorder %s4476_s12, 0 }
 0x675   : > { %p4513_p12 = scmp.ge.s32.totalorder %s3594_s30, 2  ;;  %s2733_s13 = scalar_lea.sflag [#allocation4], %s2732_s11 }
 0x677   : > { %p3309_p1 = pnand %p4513_p12, %p4512_p9 }
 0x679   : > { %3577 = dma.done.wait (!%p3309_p1), %s2733_s13, 1024  }
 0x67a   : > { %3579 = vsyncadd (!%p3309_p1), %s2733_s13, 4294966272  ;;  %p22_p13 = scmp.ge.s32.totalorder %s3769_s16, 4   ;;  %s4514_s27 = smov %s3586_s28 }
 0x67b   : > { %s4515_s28 = smov %s3590_s29  ;;  %s4516_s29 = smov %s3785_s23 }
 0x67c   : > { %s4517_s30 = smov %s3769_s16  ;;  %24 = sbr.rel (!%p22_p13) target bundleno = 6 (0x6), region = 112 }
 0x683   :  { %2738 = vsyncpa [#allocation3], 1 }
 0x684   :  { %2740 = vsyncpa [#allocation3 + $0x1], 1 }
 0x685   :  { %2741 = vsyncpa [#allocation6], 1 }
 0x686   :  { %2742 = vsyncpa [#allocation4], 1 }
 0x687   :  { %2744 = vsyncpa [#allocation4 + $0x1], 1 }

</bundles_post_ra>
